<compile_context>
chip_gen: v7x
topology: tpu7x:2x2x1
jax: 0.10.0
libtpu: 0.0.40
codegen_flags: <defaults>
</compile_context>

<pallas_src>
import functools
import math

import jax
import jax.numpy as jnp
from jax.experimental import pallas as pl
from jax.experimental.pallas import tpu as pltpu

LANE = 128


def _pad_dim(n: int) -> int:
    """Pad a feature dim up to whole 128-lane slots (zero-width -> one slot)."""
    if n <= 0:
        return LANE
    return ((n + LANE - 1) // LANE) * LANE


def _apply_act(y, act):
    if act == "relu":
        return jnp.maximum(y, 0.0)
    if act in ("leakyrelu", "lrelu"):
        return jnp.where(y > 0.0, y, 0.2 * y)      # nn.LeakyReLU(0.2) per reference
    if act in ("tahn", "tanh"):                    # reference spells it 'tahn'
        return jnp.tanh(y)
    return y


# ---------------------------------------------------------------------------
# The single fused kernel: full CDVAE forward on VMEM-resident weights.
# ---------------------------------------------------------------------------
def _cdvae_kernel(meta, act, xn_ref, xa_ref, a_ref, eps_ref, w_ref, b_ref,
                  main_ref, dis_ref):
    B = xn_ref.shape[0]
    f32 = jnp.float32

    def dense(h, layer):
        off, k, n, boff = layer
        w = w_ref[off:off + k, 0:n]                 # static, 128-aligned VMEM view
        b = b_ref[0:1, boff:boff + n]
        y = jnp.dot(h.astype(w_ref.dtype), w, preferred_element_type=f32)
        return y + b

    def mlp(x, layers):
        h = x
        for lyr in layers[:-1]:                     # hidden Linear + act stack
            h = _apply_act(dense(h, lyr), act)
        return dense(h, layers[-1])                 # head (no activation)

    lm = meta["layers"]
    un_pad, ua_pad = meta["un_pad"], meta["ua_pad"]
    xnc_pad, xnb_pad = meta["xnc_pad"], meta["xnb_pad"]
    xac_pad, xab_pad = meta["xac_pad"], meta["xab_pad"]

    xn = xn_ref[...]
    xa = xa_ref[...]
    a = a_ref[...]
    eps = eps_ref[...]

    # counterfactual treatment 1-a (pad lanes kept at zero)
    lane = jax.lax.broadcasted_iota(jnp.int32, a.shape, 1)
    cf_a = jnp.where(lane < meta["a_dim"], 1.0 - a, 0.0)
    a2 = jnp.concatenate([a, cf_a], axis=0)                      # (2B, a_pad)

    eo = meta["eps_off"]
    eps_un_f = eps[:, eo[0]:eo[0] + un_pad]
    eps_un_cf = eps[:, eo[1]:eo[1] + un_pad]
    eps_un_dis = eps[:, eo[2]:eo[2] + un_pad]
    eps_ua_f = eps[:, eo[3]:eo[3] + ua_pad]
    eps_ua_cf = eps[:, eo[4]:eo[4] + ua_pad]
    eps_ua_dis = eps[:, eo[5]:eo[5] + ua_pad]

    # ---- enc_xn: mu/logvar do not depend on a -> computed once (B rows),
    #      reparameterised twice with independent eps (reference semantics).
    h = mlp(xn, lm["enc_xn"])
    mu_un, lv_un = h[:, :un_pad], h[:, un_pad:2 * un_pad]
    std_un = jnp.exp(0.5 * lv_un)
    un = eps_un_f * std_un + mu_un
    cf_un = eps_un_cf * std_un + mu_un
    un2 = jnp.concatenate([un, cf_un], axis=0)                   # (2B, un_pad)

    # ---- enc_xa on [xa|a ; xa|1-a]  (factual + counterfactual batched)
    xa2 = jnp.concatenate([xa, xa], axis=0)
    h = mlp(jnp.concatenate([xa2, a2], axis=1), lm["enc_xa"])
    mu_ua2, lv_ua2 = h[:, :ua_pad], h[:, ua_pad:2 * ua_pad]
    eps_ua2 = jnp.concatenate([eps_ua_f, eps_ua_cf], axis=0)
    ua2 = eps_ua2 * jnp.exp(0.5 * lv_ua2) + mu_ua2               # (2B, ua_pad)

    # ---- decoders on the 2B batch
    h = mlp(un2, lm["dec_uxn"])
    xnc2 = h[:, :xnc_pad]
    xnb2 = jax.nn.sigmoid(h[:, xnc_pad:xnc_pad + xnb_pad])
    xn_rec2 = jnp.concatenate([xnc2, xnb2], axis=1)              # same slots as xn

    h = mlp(jnp.concatenate([ua2, a2], axis=1), lm["dec_uxa"])
    xac2 = h[:, :xac_pad]
    xab2 = jax.nn.sigmoid(h[:, xac_pad:xac_pad + xab_pad])
    xa_rec2 = jnp.concatenate([xac2, xab2], axis=1)              # same slots as xa

    h = mlp(jnp.concatenate([un2, ua2, a2], axis=1), lm["dec_uy"])
    y2 = jax.nn.sigmoid(h)

    # ---- distilled counterfactual re-encode of the reconstructions
    #      (filter_dummy_x is the identity in this slot layout: zero-dim
    #       components occupy all-zero-weight slots).  Run on 2B rows to keep
    #       bf16 vregs packed; only the CF half (rows B:2B) is consumed.
    h = mlp(xn_rec2, lm["enc_xn"])
    mu_d, lv_d = h[B:, :un_pad], h[B:, un_pad:2 * un_pad]
    cf_uxn_dis = eps_un_dis * jnp.exp(0.5 * lv_d) + mu_d

    h = mlp(jnp.concatenate([xa_rec2, a2], axis=1), lm["enc_xa"])
    mu_d, lv_d = h[B:, :ua_pad], h[B:, ua_pad:2 * ua_pad]
    cf_uxa_dis = eps_ua_dis * jnp.exp(0.5 * lv_d) + mu_d

    # ---- lane-dense packed outputs (rows 0:B factual, B:2B counterfactual)
    mo = meta["main_off"]
    outs = {
        "un": un2, "ua": ua2,
        "mu_un": jnp.concatenate([mu_un, mu_un], axis=0),
        "lv_un": jnp.concatenate([lv_un, lv_un], axis=0),
        "mu_ua": mu_ua2, "lv_ua": lv_ua2,
        "xnc": xnc2, "xnb": xnb2, "xac": xac2, "xab": xab2, "y": y2,
    }
    for name, blk in outs.items():
        off = mo[name]
        main_ref[:, off:off + blk.shape[1]] = blk
    dis_ref[:, :un_pad] = cf_uxn_dis
    dis_ref[:, un_pad:un_pad + ua_pad] = cf_uxa_dis


# ---------------------------------------------------------------------------
# Parameter construction: slot-padded weights packed into two blobs.
# ---------------------------------------------------------------------------
def _init_packed_linear(key, in_dims, in_pads, out_dims, out_pads):
    """He-style init; real rows/cols scattered into their 128-lane slots."""
    kin, nout = sum(in_pads), sum(out_pads)
    rin, rout = sum(in_dims), sum(out_dims)
    w = jnp.zeros((kin, nout), jnp.float32)
    if rin > 0 and rout > 0:
        w_real = jax.random.normal(key, (rin, rout), jnp.float32) * math.sqrt(2.0 / rin)
        ri, si = 0, 0
        for di, pi in zip(in_dims, in_pads):
            rj, sj = 0, 0
            for dj, pj in zip(out_dims, out_pads):
                if di > 0 and dj > 0:
                    w = w.at[si:si + di, sj:sj + dj].set(w_real[ri:ri + di, rj:rj + dj])
                rj += dj
                sj += pj
            ri += di
            si += pi
    b = jnp.zeros((1, nout), jnp.float32)
    return w, b


def _mlp_layers(key, in_dims, in_pads, out_dims, out_pads, h_dim, h_layers):
    h_pad = _pad_dim(h_dim)
    mats = []
    cur_dims, cur_pads = in_dims, in_pads
    for _ in range(h_layers):
        key, sub = jax.random.split(key)
        mats.append(_init_packed_linear(sub, cur_dims, cur_pads, [h_dim], [h_pad]))
        cur_dims, cur_pads = [h_dim], [h_pad]
    key, sub = jax.random.split(key)
    mats.append(_init_packed_linear(sub, cur_dims, cur_pads, out_dims, out_pads))
    return mats


def init_cdvae(key, dims, cfg):
    h_dim, h_layers = cfg["h_dim"], cfg["h_layers"]
    un, ua = cfg["un_dim"], cfg["ua_dim"]
    weight_dtype = cfg.get("weight_dtype", jnp.bfloat16)

    p = {
        "xnc": _pad_dim(dims["xnc"]), "xnb": _pad_dim(dims["xnb"]),
        "xac": _pad_dim(dims["xac"]), "xab": _pad_dim(dims["xab"]),
        "a": _pad_dim(dims["a"]), "y": _pad_dim(dims["y"]),
        "un": _pad_dim(un), "ua": _pad_dim(ua),
    }

    k = jax.random.split(key, 5)
    nets = {
        "enc_xn": _mlp_layers(k[0], [dims["xnc"], dims["xnb"]], [p["xnc"], p["xnb"]],
                              [un, un], [p["un"], p["un"]], h_dim, h_layers),
        "enc_xa": _mlp_layers(k[1], [dims["xac"], dims["xab"], dims["a"]],
                              [p["xac"], p["xab"], p["a"]],
                              [ua, ua], [p["ua"], p["ua"]], h_dim, h_layers),
        "dec_uxn": _mlp_layers(k[2], [un], [p["un"]],
                               [dims["xnc"], dims["xnb"]], [p["xnc"], p["xnb"]],
                               h_dim, h_layers),
        "dec_uxa": _mlp_layers(k[3], [ua, dims["a"]], [p["ua"], p["a"]],
                               [dims["xac"], dims["xab"]], [p["xac"], p["xab"]],
                               h_dim, h_layers),
        "dec_uy": _mlp_layers(k[4], [un, ua, dims["a"]], [p["un"], p["ua"], p["a"]],
                              [dims["y"]], [p["y"]], h_dim, h_layers),
    }

    # Pack every matrix into one row-blob and every bias into one lane-blob.
    n_blob = max(w.shape[1] for net in nets.values() for w, _ in net)
    layer_meta, w_rows, b_cols = {}, [], []
    row_off, lidx = 0, 0
    for name, net in nets.items():
        lm = []
        for w, b in net:
            kk, nn = w.shape
            lm.append((row_off, kk, nn, lidx * n_blob))
            w_rows.append(jnp.pad(w, ((0, 0), (0, n_blob - nn))))
            b_cols.append(jnp.pad(b, ((0, 0), (0, n_blob - nn))))
            row_off += kk
            lidx += 1
        layer_meta[name] = lm
    W = jnp.concatenate(w_rows, axis=0).astype(weight_dtype)     # (K_total, n_blob)
    bvec = jnp.concatenate(b_cols, axis=1)                       # (1, n_layers*n_blob)

    slot_order = [("un", p["un"]), ("ua", p["ua"]), ("mu_un", p["un"]),
                  ("lv_un", p["un"]), ("mu_ua", p["ua"]), ("lv_ua", p["ua"]),
                  ("xnc", p["xnc"]), ("xnb", p["xnb"]), ("xac", p["xac"]),
                  ("xab", p["xab"]), ("y", p["y"])]
    main_off, off = {}, 0
    for name, width in slot_order:
        main_off[name] = off
        off += width

    eps_off = (0, p["un"], 2 * p["un"], 3 * p["un"],
               3 * p["un"] + p["ua"], 3 * p["un"] + 2 * p["ua"])

    meta = {
        "un_pad": p["un"], "ua_pad": p["ua"],
        "xnc_pad": p["xnc"], "xnb_pad": p["xnb"],
        "xac_pad": p["xac"], "xab_pad": p["xab"],
        "a_pad": p["a"], "y_pad": p["y"], "a_dim": dims["a"],
        "un_dim": un, "ua_dim": ua,
        "layers": layer_meta, "main_off": main_off, "main_width": off,
        "eps_off": eps_off, "eps_width": 3 * p["un"] + 3 * p["ua"],
    }
    return {"W": W, "b": bvec, "meta": meta}


# ---------------------------------------------------------------------------
# Thin JAX wrapper: slot-pack inputs, one pallas_call, slice final outputs.
# ---------------------------------------------------------------------------
def _slot_pack(x, comp_dims, comp_pads):
    parts, c = [], 0
    for d, pad in zip(comp_dims, comp_pads):
        blk = x[:, c:c + d]
        parts.append(jnp.pad(blk, ((0, 0), (0, pad - d))))
        c += d
    return jnp.concatenate(parts, axis=1)


def _cost(meta, B, params):
    rows = {"enc_xn": B, "enc_xa": 2 * B, "dec_uxn": 2 * B,
            "dec_uxa": 2 * B, "dec_uy": 2 * B}
    flops = 0
    for name, layers in meta["layers"].items():
        per = sum(2 * kk * nn for (_, kk, nn, _) in layers)
        flops += rows[name] * per
        if name in ("enc_xn", "enc_xa"):            # distilled re-encode pass
            flops += 2 * B * per
    transc = 2 * B * (3 * meta["un_pad"] + 3 * meta["ua_pad"] +
                      meta["xnb_pad"] + meta["xab_pad"] + meta["y_pad"])
    bytes_acc = (params["W"].size * params["W"].dtype.itemsize +
                 params["b"].size * 4 +
                 B * (meta["xnc_pad"] + meta["xnb_pad"] + meta["xac_pad"] +
                      meta["xab_pad"] + meta["a_pad"] + meta["eps_width"]) * 4 +
                 2 * B * meta["main_width"] * 4 +
                 B * (meta["un_pad"] + meta["ua_pad"]) * 4)
    return int(flops), int(transc), int(bytes_acc)


def cdvae_forward(params, dims, cfg, xn, xa, a, key):
    meta = params["meta"]
    B = xn.shape[0]
    act = cfg["act_fn"]

    xn_p = _slot_pack(xn, [dims["xnc"], dims["xnb"]], [meta["xnc_pad"], meta["xnb_pad"]])
    xa_p = _slot_pack(xa, [dims["xac"], dims["xab"]], [meta["xac_pad"], meta["xab_pad"]])
    a_p = _slot_pack(a, [dims["a"]], [meta["a_pad"]])
    eps = jax.random.normal(key, (B, meta["eps_width"]), jnp.float32)

    flops, transc, bytes_acc = _cost(meta, B, params)
    kernel = functools.partial(_cdvae_kernel, meta, act)
    vspec = lambda: pl.BlockSpec(memory_space=pltpu.MemorySpace.VMEM)

    main, dis = pl.pallas_call(
        kernel,
        out_shape=(
            jax.ShapeDtypeStruct((2 * B, meta["main_width"]), jnp.float32),
            jax.ShapeDtypeStruct((B, meta["un_pad"] + meta["ua_pad"]), jnp.float32),
        ),
        in_specs=[vspec() for _ in range(6)],
        out_specs=(vspec(), vspec()),
        compiler_params=pltpu.CompilerParams(vmem_limit_bytes=32 * 1024 * 1024),
        cost_estimate=pl.CostEstimate(flops=flops, transcendentals=transc,
                                      bytes_accessed=bytes_acc),
    )(xn_p, xa_p, a_p, eps, params["W"], params["b"])

    # Final loss-facing slices (done once, here).
    mo = meta["main_off"]
    un_d, ua_d = meta["un_dim"], meta["ua_dim"]

    def halves(name, d):
        o = mo[name]
        col = main[:, o:o + d]
        return col[:B], col[B:]

    un, cf_un = halves("un", un_d)
    ua, cf_ua = halves("ua", ua_d)
    mu_un, cf_mu_un = halves("mu_un", un_d)
    lv_un, cf_lv_un = halves("lv_un", un_d)
    mu_ua, cf_mu_ua = halves("mu_ua", ua_d)
    lv_ua, cf_lv_ua = halves("lv_ua", ua_d)
    r_xnc, cf_r_xnc = halves("xnc", dims["xnc"])
    r_xnb, cf_r_xnb = halves("xnb", dims["xnb"])
    r_xac, cf_r_xac = halves("xac", dims["xac"])
    r_xab, cf_r_xab = halves("xab", dims["xab"])
    r_y, cf_r_y = halves("y", dims["y"])

    mu = jnp.concatenate([mu_un, mu_ua], axis=1)
    logvar = jnp.concatenate([lv_un, lv_ua], axis=1)
    cf_mu = jnp.concatenate([cf_mu_un, cf_mu_ua], axis=1)
    cf_logvar = jnp.concatenate([cf_lv_un, cf_lv_ua], axis=1)

    factual = (un, ua, mu, logvar, r_xnc, r_xnb, r_xac, r_xab, r_y)
    counter = (cf_un, cf_ua, cf_mu, cf_logvar,
               cf_r_xnc, cf_r_xnb, cf_r_xac, cf_r_xab, cf_r_y)
    distilled_cf = (dis[:, :un_d],
                    dis[:, meta["un_pad"]:meta["un_pad"] + ua_d])
    return factual, counter, distilled_cf


# ---------------------------------------------------------------------------
# Demo
# ---------------------------------------------------------------------------
if __name__ == "__main__":
    dims = {"xnc": 3, "xnb": 2, "xac": 3, "xab": 2, "a": 1, "y": 1}
    cfg = {"un_dim": 4, "ua_dim": 4, "h_dim": 32, "h_layers": 2, "act_fn": "relu"}
    B = 8  # multiple of 8 (f32 sublane); factual+CF batch of 16 fills a bf16 vreg

    root = jax.random.PRNGKey(0)
    k_param, k_xn, k_xa, k_a, k_fwd = jax.random.split(root, 5)

    params = init_cdvae(k_param, dims, cfg)

    xn = jax.random.normal(k_xn, (B, dims["xnc"] + dims["xnb"]), jnp.float32)
    xa = jax.random.normal(k_xa, (B, dims["xac"] + dims["xab"]), jnp.float32)
    a = jax.random.bernoulli(k_a, 0.5, (B, dims["a"])).astype(jnp.float32)

    # params / dims / cfg closed over so all packing metadata stays Python-static.
    fwd = jax.jit(lambda xn_, xa_, a_, key_: cdvae_forward(params, dims, cfg,
                                                           xn_, xa_, a_, key_))
    factual, counter, distilled_cf = fwd(xn, xa, a, k_fwd)
    jax.block_until_ready((factual, counter, distilled_cf))

    # shape / sanity checks
    assert factual[0].shape == (B, cfg["un_dim"])
    assert factual[1].shape == (B, cfg["ua_dim"])
    assert factual[2].shape == (B, cfg["un_dim"] + cfg["ua_dim"])
    assert factual[3].shape == (B, cfg["un_dim"] + cfg["ua_dim"])
    assert factual[4].shape == (B, dims["xnc"])
    assert factual[5].shape == (B, dims["xnb"])
    assert factual[6].shape == (B, dims["xac"])
    assert factual[7].shape == (B, dims["xab"])
    assert factual[8].shape == (B, dims["y"])
    assert counter[8].shape == (B, dims["y"])
    assert distilled_cf[0].shape == (B, cfg["un_dim"])
    assert distilled_cf[1].shape == (B, cfg["ua_dim"])
    assert all(bool(jnp.all(jnp.isfinite(t)))
               for t in factual + counter + distilled_cf)
    # enc_xn is deterministic, so factual and counterfactual mu_un must agree.
    assert bool(jnp.allclose(factual[2][:, :cfg["un_dim"]],
                             counter[2][:, :cfg["un_dim"]]))

    print("KERNEL_OK")
</pallas_src>

<mosaic_0001>
module attributes {stable_mosaic.version = 11 : i64} {
  func.func @_cdvae_kernel(%arg0: memref<8x256xf32, #tpu.memory_space<vmem>>, %arg1: memref<8x256xf32, #tpu.memory_space<vmem>>, %arg2: memref<8x128xf32, #tpu.memory_space<vmem>>, %arg3: memref<8x768xf32, #tpu.memory_space<vmem>>, %arg4: memref<2688x256xbf16, #tpu.memory_space<vmem>>, %arg5: memref<1x3840xf32, #tpu.memory_space<vmem>>, %arg6: memref<16x1408xf32, #tpu.memory_space<vmem>>, %arg7: memref<8x256xf32, #tpu.memory_space<vmem>>) attributes {dimension_semantics = [], scalar_prefetch = 0 : i64, scratch_operands = 0 : i64, tpu.core_type = #tpu.core_type<tc>} {
    %c0 = arith.constant 0 : index
    %c0_0 = arith.constant 0 : index
    %0 = vector.load %arg0[%c0, %c0_0] : memref<8x256xf32, #tpu.memory_space<vmem>>, vector<8x256xf32>
    %c0_1 = arith.constant 0 : index
    %c0_2 = arith.constant 0 : index
    %1 = vector.load %arg1[%c0_1, %c0_2] : memref<8x256xf32, #tpu.memory_space<vmem>>, vector<8x256xf32>
    %c0_3 = arith.constant 0 : index
    %c0_4 = arith.constant 0 : index
    %2 = vector.load %arg2[%c0_3, %c0_4] : memref<8x128xf32, #tpu.memory_space<vmem>>, vector<8x128xf32>
    %c0_5 = arith.constant 0 : index
    %c0_6 = arith.constant 0 : index
    %3 = vector.load %arg3[%c0_5, %c0_6] : memref<8x768xf32, #tpu.memory_space<vmem>>, vector<8x768xf32>
    %4 = tpu.iota {dimensions = array<i32: 1>} : vector<8x128xi32>
    %c1_i32 = arith.constant 1 : i32
    %5 = vector.broadcast %c1_i32 : i32 to vector<8x128xi32>
    %6 = arith.cmpi slt, %4, %5 : vector<8x128xi32>
    %cst = arith.constant 1.000000e+00 : f32
    %7 = vector.broadcast %cst : f32 to vector<8x128xf32>
    %8 = arith.subf %7, %2 : vector<8x128xf32>
    %cst_7 = arith.constant 0.000000e+00 : f32
    %9 = vector.broadcast %cst_7 : f32 to vector<8x128xf32>
    %10 = arith.select %6, %8, %9 : vector<8x128xi1>, vector<8x128xf32>
    %11 = tpu.concatenate %2, %10 in 0 : vector<8x128xf32>, vector<8x128xf32> -> vector<16x128xf32>
    %12 = vector.extract_strided_slice %3 {offsets = [0, 0], sizes = [8, 128], strides = [1, 1]} : vector<8x768xf32> to vector<8x128xf32>
    %13 = vector.extract_strided_slice %3 {offsets = [0, 128], sizes = [8, 128], strides = [1, 1]} : vector<8x768xf32> to vector<8x128xf32>
    %14 = vector.extract_strided_slice %3 {offsets = [0, 256], sizes = [8, 128], strides = [1, 1]} : vector<8x768xf32> to vector<8x128xf32>
    %15 = vector.extract_strided_slice %3 {offsets = [0, 384], sizes = [8, 128], strides = [1, 1]} : vector<8x768xf32> to vector<8x128xf32>
    %16 = vector.extract_strided_slice %3 {offsets = [0, 512], sizes = [8, 128], strides = [1, 1]} : vector<8x768xf32> to vector<8x128xf32>
    %17 = vector.extract_strided_slice %3 {offsets = [0, 640], sizes = [8, 128], strides = [1, 1]} : vector<8x768xf32> to vector<8x128xf32>
    %c0_8 = arith.constant 0 : index
    %c0_9 = arith.constant 0 : index
    %18 = vector.load %arg4[%c0_8, %c0_9] : memref<2688x256xbf16, #tpu.memory_space<vmem>>, vector<256x128xbf16>
    %c0_10 = arith.constant 0 : index
    %c0_11 = arith.constant 0 : index
    %19 = vector.load %arg5[%c0_10, %c0_11] : memref<1x3840xf32, #tpu.memory_space<vmem>>, vector<1x128xf32>
    %20 = arith.truncf %0 : vector<8x256xf32> to vector<8x256xbf16>
    %cst_12 = arith.constant dense<0.000000e+00> : vector<8x128xf32>
    %21 = tpu.matmul %20, %18, %cst_12 {dimension_numbers = #tpu.dot_dimension_numbers<[1], [0], [0], [1], [0, 0, 1, 1], [], []>} : vector<8x256xbf16>, vector<256x128xbf16>, vector<8x128xf32> -> vector<8x128xf32>
    %22 = vector.broadcast %19 : vector<1x128xf32> to vector<8x128xf32>
    %23 = arith.addf %21, %22 : vector<8x128xf32>
    %cst_13 = arith.constant 0.000000e+00 : f32
    %24 = vector.broadcast %cst_13 : f32 to vector<8x128xf32>
    %25 = arith.maximumf %23, %24 : vector<8x128xf32>
    %c256 = arith.constant 256 : index
    %c0_14 = arith.constant 0 : index
    %26 = vector.load %arg4[%c256, %c0_14] : memref<2688x256xbf16, #tpu.memory_space<vmem>>, vector<128x128xbf16>
    %c0_15 = arith.constant 0 : index
    %c256_16 = arith.constant 256 : index
    %27 = vector.load %arg5[%c0_15, %c256_16] : memref<1x3840xf32, #tpu.memory_space<vmem>>, vector<1x128xf32>
    %28 = arith.truncf %25 : vector<8x128xf32> to vector<8x128xbf16>
    %cst_17 = arith.constant dense<0.000000e+00> : vector<8x128xf32>
    %29 = tpu.matmul %28, %26, %cst_17 {dimension_numbers = #tpu.dot_dimension_numbers<[1], [0], [0], [1], [0, 0, 1, 1], [], []>} : vector<8x128xbf16>, vector<128x128xbf16>, vector<8x128xf32> -> vector<8x128xf32>
    %30 = vector.broadcast %27 : vector<1x128xf32> to vector<8x128xf32>
    %31 = arith.addf %29, %30 : vector<8x128xf32>
    %cst_18 = arith.constant 0.000000e+00 : f32
    %32 = vector.broadcast %cst_18 : f32 to vector<8x128xf32>
    %33 = arith.maximumf %31, %32 : vector<8x128xf32>
    %c384 = arith.constant 384 : index
    %c0_19 = arith.constant 0 : index
    %34 = vector.load %arg4[%c384, %c0_19] : memref<2688x256xbf16, #tpu.memory_space<vmem>>, vector<128x256xbf16>
    %c0_20 = arith.constant 0 : index
    %c512 = arith.constant 512 : index
    %35 = vector.load %arg5[%c0_20, %c512] : memref<1x3840xf32, #tpu.memory_space<vmem>>, vector<1x256xf32>
    %36 = arith.truncf %33 : vector<8x128xf32> to vector<8x128xbf16>
    %cst_21 = arith.constant dense<0.000000e+00> : vector<8x256xf32>
    %37 = tpu.matmul %36, %34, %cst_21 {dimension_numbers = #tpu.dot_dimension_numbers<[1], [0], [0], [1], [0, 0, 1, 1], [], []>} : vector<8x128xbf16>, vector<128x256xbf16>, vector<8x256xf32> -> vector<8x256xf32>
    %38 = vector.broadcast %35 : vector<1x256xf32> to vector<8x256xf32>
    %39 = arith.addf %37, %38 : vector<8x256xf32>
    %40 = vector.extract_strided_slice %39 {offsets = [0, 0], sizes = [8, 128], strides = [1, 1]} : vector<8x256xf32> to vector<8x128xf32>
    %41 = vector.extract_strided_slice %39 {offsets = [0, 128], sizes = [8, 128], strides = [1, 1]} : vector<8x256xf32> to vector<8x128xf32>
    %cst_22 = arith.constant 5.000000e-01 : f32
    %42 = vector.broadcast %cst_22 : f32 to vector<8x128xf32>
    %43 = arith.mulf %42, %41 : vector<8x128xf32>
    %44 = math.exp %43 : vector<8x128xf32>
    %45 = arith.mulf %12, %44 : vector<8x128xf32>
    %46 = arith.addf %45, %40 : vector<8x128xf32>
    %47 = arith.mulf %13, %44 : vector<8x128xf32>
    %48 = arith.addf %47, %40 : vector<8x128xf32>
    %49 = tpu.concatenate %46, %48 in 0 : vector<8x128xf32>, vector<8x128xf32> -> vector<16x128xf32>
    %50 = tpu.concatenate %1, %1 in 0 : vector<8x256xf32>, vector<8x256xf32> -> vector<16x256xf32>
    %51 = tpu.concatenate %50, %11 in 1 : vector<16x256xf32>, vector<16x128xf32> -> vector<16x384xf32>
    %c512_23 = arith.constant 512 : index
    %c0_24 = arith.constant 0 : index
    %52 = vector.load %arg4[%c512_23, %c0_24] : memref<2688x256xbf16, #tpu.memory_space<vmem>>, vector<384x128xbf16>
    %c0_25 = arith.constant 0 : index
    %c768 = arith.constant 768 : index
    %53 = vector.load %arg5[%c0_25, %c768] : memref<1x3840xf32, #tpu.memory_space<vmem>>, vector<1x128xf32>
    %54 = arith.truncf %51 : vector<16x384xf32> to vector<16x384xbf16>
    %cst_26 = arith.constant dense<0.000000e+00> : vector<16x128xf32>
    %55 = tpu.matmul %54, %52, %cst_26 {dimension_numbers = #tpu.dot_dimension_numbers<[1], [0], [0], [1], [0, 0, 1, 1], [], []>} : vector<16x384xbf16>, vector<384x128xbf16>, vector<16x128xf32> -> vector<16x128xf32>
    %56 = vector.broadcast %53 : vector<1x128xf32> to vector<16x128xf32>
    %57 = arith.addf %55, %56 : vector<16x128xf32>
    %cst_27 = arith.constant 0.000000e+00 : f32
    %58 = vector.broadcast %cst_27 : f32 to vector<16x128xf32>
    %59 = arith.maximumf %57, %58 : vector<16x128xf32>
    %c896 = arith.constant 896 : index
    %c0_28 = arith.constant 0 : index
    %60 = vector.load %arg4[%c896, %c0_28] : memref<2688x256xbf16, #tpu.memory_space<vmem>>, vector<128x128xbf16>
    %c0_29 = arith.constant 0 : index
    %c1024 = arith.constant 1024 : index
    %61 = vector.load %arg5[%c0_29, %c1024] : memref<1x3840xf32, #tpu.memory_space<vmem>>, vector<1x128xf32>
    %62 = arith.truncf %59 : vector<16x128xf32> to vector<16x128xbf16>
    %cst_30 = arith.constant dense<0.000000e+00> : vector<16x128xf32>
    %63 = tpu.matmul %62, %60, %cst_30 {dimension_numbers = #tpu.dot_dimension_numbers<[1], [0], [0], [1], [0, 0, 1, 1], [], []>} : vector<16x128xbf16>, vector<128x128xbf16>, vector<16x128xf32> -> vector<16x128xf32>
    %64 = vector.broadcast %61 : vector<1x128xf32> to vector<16x128xf32>
    %65 = arith.addf %63, %64 : vector<16x128xf32>
    %cst_31 = arith.constant 0.000000e+00 : f32
    %66 = vector.broadcast %cst_31 : f32 to vector<16x128xf32>
    %67 = arith.maximumf %65, %66 : vector<16x128xf32>
    %c1024_32 = arith.constant 1024 : index
    %c0_33 = arith.constant 0 : index
    %68 = vector.load %arg4[%c1024_32, %c0_33] : memref<2688x256xbf16, #tpu.memory_space<vmem>>, vector<128x256xbf16>
    %c0_34 = arith.constant 0 : index
    %c1280 = arith.constant 1280 : index
    %69 = vector.load %arg5[%c0_34, %c1280] : memref<1x3840xf32, #tpu.memory_space<vmem>>, vector<1x256xf32>
    %70 = arith.truncf %67 : vector<16x128xf32> to vector<16x128xbf16>
    %cst_35 = arith.constant dense<0.000000e+00> : vector<16x256xf32>
    %71 = tpu.matmul %70, %68, %cst_35 {dimension_numbers = #tpu.dot_dimension_numbers<[1], [0], [0], [1], [0, 0, 1, 1], [], []>} : vector<16x128xbf16>, vector<128x256xbf16>, vector<16x256xf32> -> vector<16x256xf32>
    %72 = vector.broadcast %69 : vector<1x256xf32> to vector<16x256xf32>
    %73 = arith.addf %71, %72 : vector<16x256xf32>
    %74 = vector.extract_strided_slice %73 {offsets = [0, 0], sizes = [16, 128], strides = [1, 1]} : vector<16x256xf32> to vector<16x128xf32>
    %75 = vector.extract_strided_slice %73 {offsets = [0, 128], sizes = [16, 128], strides = [1, 1]} : vector<16x256xf32> to vector<16x128xf32>
    %76 = tpu.concatenate %15, %16 in 0 : vector<8x128xf32>, vector<8x128xf32> -> vector<16x128xf32>
    %cst_36 = arith.constant 5.000000e-01 : f32
    %77 = vector.broadcast %cst_36 : f32 to vector<16x128xf32>
    %78 = arith.mulf %77, %75 : vector<16x128xf32>
    %79 = math.exp %78 : vector<16x128xf32>
    %80 = arith.mulf %76, %79 : vector<16x128xf32>
    %81 = arith.addf %80, %74 : vector<16x128xf32>
    %c1152 = arith.constant 1152 : index
    %c0_37 = arith.constant 0 : index
    %82 = vector.load %arg4[%c1152, %c0_37] : memref<2688x256xbf16, #tpu.memory_space<vmem>>, vector<128x128xbf16>
    %c0_38 = arith.constant 0 : index
    %c1536 = arith.constant 1536 : index
    %83 = vector.load %arg5[%c0_38, %c1536] : memref<1x3840xf32, #tpu.memory_space<vmem>>, vector<1x128xf32>
    %84 = arith.truncf %49 : vector<16x128xf32> to vector<16x128xbf16>
    %cst_39 = arith.constant dense<0.000000e+00> : vector<16x128xf32>
    %85 = tpu.matmul %84, %82, %cst_39 {dimension_numbers = #tpu.dot_dimension_numbers<[1], [0], [0], [1], [0, 0, 1, 1], [], []>} : vector<16x128xbf16>, vector<128x128xbf16>, vector<16x128xf32> -> vector<16x128xf32>
    %86 = vector.broadcast %83 : vector<1x128xf32> to vector<16x128xf32>
    %87 = arith.addf %85, %86 : vector<16x128xf32>
    %cst_40 = arith.constant 0.000000e+00 : f32
    %88 = vector.broadcast %cst_40 : f32 to vector<16x128xf32>
    %89 = arith.maximumf %87, %88 : vector<16x128xf32>
    %c1280_41 = arith.constant 1280 : index
    %c0_42 = arith.constant 0 : index
    %90 = vector.load %arg4[%c1280_41, %c0_42] : memref<2688x256xbf16, #tpu.memory_space<vmem>>, vector<128x128xbf16>
    %c0_43 = arith.constant 0 : index
    %c1792 = arith.constant 1792 : index
    %91 = vector.load %arg5[%c0_43, %c1792] : memref<1x3840xf32, #tpu.memory_space<vmem>>, vector<1x128xf32>
    %92 = arith.truncf %89 : vector<16x128xf32> to vector<16x128xbf16>
    %cst_44 = arith.constant dense<0.000000e+00> : vector<16x128xf32>
    %93 = tpu.matmul %92, %90, %cst_44 {dimension_numbers = #tpu.dot_dimension_numbers<[1], [0], [0], [1], [0, 0, 1, 1], [], []>} : vector<16x128xbf16>, vector<128x128xbf16>, vector<16x128xf32> -> vector<16x128xf32>
    %94 = vector.broadcast %91 : vector<1x128xf32> to vector<16x128xf32>
    %95 = arith.addf %93, %94 : vector<16x128xf32>
    %cst_45 = arith.constant 0.000000e+00 : f32
    %96 = vector.broadcast %cst_45 : f32 to vector<16x128xf32>
    %97 = arith.maximumf %95, %96 : vector<16x128xf32>
    %c1408 = arith.constant 1408 : index
    %c0_46 = arith.constant 0 : index
    %98 = vector.load %arg4[%c1408, %c0_46] : memref<2688x256xbf16, #tpu.memory_space<vmem>>, vector<128x256xbf16>
    %c0_47 = arith.constant 0 : index
    %c2048 = arith.constant 2048 : index
    %99 = vector.load %arg5[%c0_47, %c2048] : memref<1x3840xf32, #tpu.memory_space<vmem>>, vector<1x256xf32>
    %100 = arith.truncf %97 : vector<16x128xf32> to vector<16x128xbf16>
    %cst_48 = arith.constant dense<0.000000e+00> : vector<16x256xf32>
    %101 = tpu.matmul %100, %98, %cst_48 {dimension_numbers = #tpu.dot_dimension_numbers<[1], [0], [0], [1], [0, 0, 1, 1], [], []>} : vector<16x128xbf16>, vector<128x256xbf16>, vector<16x256xf32> -> vector<16x256xf32>
    %102 = vector.broadcast %99 : vector<1x256xf32> to vector<16x256xf32>
    %103 = arith.addf %101, %102 : vector<16x256xf32>
    %104 = vector.extract_strided_slice %103 {offsets = [0, 0], sizes = [16, 128], strides = [1, 1]} : vector<16x256xf32> to vector<16x128xf32>
    %105 = vector.extract_strided_slice %103 {offsets = [0, 128], sizes = [16, 128], strides = [1, 1]} : vector<16x256xf32> to vector<16x128xf32>
    %106 = arith.negf %105 : vector<16x128xf32>
    %107 = math.exp %106 : vector<16x128xf32>
    %cst_49 = arith.constant 1.000000e+00 : f32
    %108 = vector.broadcast %cst_49 : f32 to vector<16x128xf32>
    %109 = arith.addf %108, %107 : vector<16x128xf32>
    %110 = arith.divf %108, %109 : vector<16x128xf32>
    %111 = tpu.concatenate %104, %110 in 1 : vector<16x128xf32>, vector<16x128xf32> -> vector<16x256xf32>
    %112 = tpu.concatenate %81, %11 in 1 : vector<16x128xf32>, vector<16x128xf32> -> vector<16x256xf32>
    %c1536_50 = arith.constant 1536 : index
    %c0_51 = arith.constant 0 : index
    %113 = vector.load %arg4[%c1536_50, %c0_51] : memref<2688x256xbf16, #tpu.memory_space<vmem>>, vector<256x128xbf16>
    %c0_52 = arith.constant 0 : index
    %c2304 = arith.constant 2304 : index
    %114 = vector.load %arg5[%c0_52, %c2304] : memref<1x3840xf32, #tpu.memory_space<vmem>>, vector<1x128xf32>
    %115 = arith.truncf %112 : vector<16x256xf32> to vector<16x256xbf16>
    %cst_53 = arith.constant dense<0.000000e+00> : vector<16x128xf32>
    %116 = tpu.matmul %115, %113, %cst_53 {dimension_numbers = #tpu.dot_dimension_numbers<[1], [0], [0], [1], [0, 0, 1, 1], [], []>} : vector<16x256xbf16>, vector<256x128xbf16>, vector<16x128xf32> -> vector<16x128xf32>
    %117 = vector.broadcast %114 : vector<1x128xf32> to vector<16x128xf32>
    %118 = arith.addf %116, %117 : vector<16x128xf32>
    %cst_54 = arith.constant 0.000000e+00 : f32
    %119 = vector.broadcast %cst_54 : f32 to vector<16x128xf32>
    %120 = arith.maximumf %118, %119 : vector<16x128xf32>
    %c1792_55 = arith.constant 1792 : index
    %c0_56 = arith.constant 0 : index
    %121 = vector.load %arg4[%c1792_55, %c0_56] : memref<2688x256xbf16, #tpu.memory_space<vmem>>, vector<128x128xbf16>
    %c0_57 = arith.constant 0 : index
    %c2560 = arith.constant 2560 : index
    %122 = vector.load %arg5[%c0_57, %c2560] : memref<1x3840xf32, #tpu.memory_space<vmem>>, vector<1x128xf32>
    %123 = arith.truncf %120 : vector<16x128xf32> to vector<16x128xbf16>
    %cst_58 = arith.constant dense<0.000000e+00> : vector<16x128xf32>
    %124 = tpu.matmul %123, %121, %cst_58 {dimension_numbers = #tpu.dot_dimension_numbers<[1], [0], [0], [1], [0, 0, 1, 1], [], []>} : vector<16x128xbf16>, vector<128x128xbf16>, vector<16x128xf32> -> vector<16x128xf32>
    %125 = vector.broadcast %122 : vector<1x128xf32> to vector<16x128xf32>
    %126 = arith.addf %124, %125 : vector<16x128xf32>
    %cst_59 = arith.constant 0.000000e+00 : f32
    %127 = vector.broadcast %cst_59 : f32 to vector<16x128xf32>
    %128 = arith.maximumf %126, %127 : vector<16x128xf32>
    %c1920 = arith.constant 1920 : index
    %c0_60 = arith.constant 0 : index
    %129 = vector.load %arg4[%c1920, %c0_60] : memref<2688x256xbf16, #tpu.memory_space<vmem>>, vector<128x256xbf16>
    %c0_61 = arith.constant 0 : index
    %c2816 = arith.constant 2816 : index
    %130 = vector.load %arg5[%c0_61, %c2816] : memref<1x3840xf32, #tpu.memory_space<vmem>>, vector<1x256xf32>
    %131 = arith.truncf %128 : vector<16x128xf32> to vector<16x128xbf16>
    %cst_62 = arith.constant dense<0.000000e+00> : vector<16x256xf32>
    %132 = tpu.matmul %131, %129, %cst_62 {dimension_numbers = #tpu.dot_dimension_numbers<[1], [0], [0], [1], [0, 0, 1, 1], [], []>} : vector<16x128xbf16>, vector<128x256xbf16>, vector<16x256xf32> -> vector<16x256xf32>
    %133 = vector.broadcast %130 : vector<1x256xf32> to vector<16x256xf32>
    %134 = arith.addf %132, %133 : vector<16x256xf32>
    %135 = vector.extract_strided_slice %134 {offsets = [0, 0], sizes = [16, 128], strides = [1, 1]} : vector<16x256xf32> to vector<16x128xf32>
    %136 = vector.extract_strided_slice %134 {offsets = [0, 128], sizes = [16, 128], strides = [1, 1]} : vector<16x256xf32> to vector<16x128xf32>
    %137 = arith.negf %136 : vector<16x128xf32>
    %138 = math.exp %137 : vector<16x128xf32>
    %cst_63 = arith.constant 1.000000e+00 : f32
    %139 = vector.broadcast %cst_63 : f32 to vector<16x128xf32>
    %140 = arith.addf %139, %138 : vector<16x128xf32>
    %141 = arith.divf %139, %140 : vector<16x128xf32>
    %142 = tpu.concatenate %135, %141 in 1 : vector<16x128xf32>, vector<16x128xf32> -> vector<16x256xf32>
    %143 = tpu.concatenate %49, %81, %11 in 1 : vector<16x128xf32>, vector<16x128xf32>, vector<16x128xf32> -> vector<16x384xf32>
    %c2048_64 = arith.constant 2048 : index
    %c0_65 = arith.constant 0 : index
    %144 = vector.load %arg4[%c2048_64, %c0_65] : memref<2688x256xbf16, #tpu.memory_space<vmem>>, vector<384x128xbf16>
    %c0_66 = arith.constant 0 : index
    %c3072 = arith.constant 3072 : index
    %145 = vector.load %arg5[%c0_66, %c3072] : memref<1x3840xf32, #tpu.memory_space<vmem>>, vector<1x128xf32>
    %146 = arith.truncf %143 : vector<16x384xf32> to vector<16x384xbf16>
    %cst_67 = arith.constant dense<0.000000e+00> : vector<16x128xf32>
    %147 = tpu.matmul %146, %144, %cst_67 {dimension_numbers = #tpu.dot_dimension_numbers<[1], [0], [0], [1], [0, 0, 1, 1], [], []>} : vector<16x384xbf16>, vector<384x128xbf16>, vector<16x128xf32> -> vector<16x128xf32>
    %148 = vector.broadcast %145 : vector<1x128xf32> to vector<16x128xf32>
    %149 = arith.addf %147, %148 : vector<16x128xf32>
    %cst_68 = arith.constant 0.000000e+00 : f32
    %150 = vector.broadcast %cst_68 : f32 to vector<16x128xf32>
    %151 = arith.maximumf %149, %150 : vector<16x128xf32>
    %c2432 = arith.constant 2432 : index
    %c0_69 = arith.constant 0 : index
    %152 = vector.load %arg4[%c2432, %c0_69] : memref<2688x256xbf16, #tpu.memory_space<vmem>>, vector<128x128xbf16>
    %c0_70 = arith.constant 0 : index
    %c3328 = arith.constant 3328 : index
    %153 = vector.load %arg5[%c0_70, %c3328] : memref<1x3840xf32, #tpu.memory_space<vmem>>, vector<1x128xf32>
    %154 = arith.truncf %151 : vector<16x128xf32> to vector<16x128xbf16>
    %cst_71 = arith.constant dense<0.000000e+00> : vector<16x128xf32>
    %155 = tpu.matmul %154, %152, %cst_71 {dimension_numbers = #tpu.dot_dimension_numbers<[1], [0], [0], [1], [0, 0, 1, 1], [], []>} : vector<16x128xbf16>, vector<128x128xbf16>, vector<16x128xf32> -> vector<16x128xf32>
    %156 = vector.broadcast %153 : vector<1x128xf32> to vector<16x128xf32>
    %157 = arith.addf %155, %156 : vector<16x128xf32>
    %cst_72 = arith.constant 0.000000e+00 : f32
    %158 = vector.broadcast %cst_72 : f32 to vector<16x128xf32>
    %159 = arith.maximumf %157, %158 : vector<16x128xf32>
    %c2560_73 = arith.constant 2560 : index
    %c0_74 = arith.constant 0 : index
    %160 = vector.load %arg4[%c2560_73, %c0_74] : memref<2688x256xbf16, #tpu.memory_space<vmem>>, vector<128x128xbf16>
    %c0_75 = arith.constant 0 : index
    %c3584 = arith.constant 3584 : index
    %161 = vector.load %arg5[%c0_75, %c3584] : memref<1x3840xf32, #tpu.memory_space<vmem>>, vector<1x128xf32>
    %162 = arith.truncf %159 : vector<16x128xf32> to vector<16x128xbf16>
    %cst_76 = arith.constant dense<0.000000e+00> : vector<16x128xf32>
    %163 = tpu.matmul %162, %160, %cst_76 {dimension_numbers = #tpu.dot_dimension_numbers<[1], [0], [0], [1], [0, 0, 1, 1], [], []>} : vector<16x128xbf16>, vector<128x128xbf16>, vector<16x128xf32> -> vector<16x128xf32>
    %164 = vector.broadcast %161 : vector<1x128xf32> to vector<16x128xf32>
    %165 = arith.addf %163, %164 : vector<16x128xf32>
    %166 = arith.negf %165 : vector<16x128xf32>
    %167 = math.exp %166 : vector<16x128xf32>
    %cst_77 = arith.constant 1.000000e+00 : f32
    %168 = vector.broadcast %cst_77 : f32 to vector<16x128xf32>
    %169 = arith.addf %168, %167 : vector<16x128xf32>
    %170 = arith.divf %168, %169 : vector<16x128xf32>
    %c0_78 = arith.constant 0 : index
    %c0_79 = arith.constant 0 : index
    %171 = vector.load %arg4[%c0_78, %c0_79] : memref<2688x256xbf16, #tpu.memory_space<vmem>>, vector<256x128xbf16>
    %c0_80 = arith.constant 0 : index
    %c0_81 = arith.constant 0 : index
    %172 = vector.load %arg5[%c0_80, %c0_81] : memref<1x3840xf32, #tpu.memory_space<vmem>>, vector<1x128xf32>
    %173 = arith.truncf %111 : vector<16x256xf32> to vector<16x256xbf16>
    %cst_82 = arith.constant dense<0.000000e+00> : vector<16x128xf32>
    %174 = tpu.matmul %173, %171, %cst_82 {dimension_numbers = #tpu.dot_dimension_numbers<[1], [0], [0], [1], [0, 0, 1, 1], [], []>} : vector<16x256xbf16>, vector<256x128xbf16>, vector<16x128xf32> -> vector<16x128xf32>
    %175 = vector.broadcast %172 : vector<1x128xf32> to vector<16x128xf32>
    %176 = arith.addf %174, %175 : vector<16x128xf32>
    %cst_83 = arith.constant 0.000000e+00 : f32
    %177 = vector.broadcast %cst_83 : f32 to vector<16x128xf32>
    %178 = arith.maximumf %176, %177 : vector<16x128xf32>
    %c256_84 = arith.constant 256 : index
    %c0_85 = arith.constant 0 : index
    %179 = vector.load %arg4[%c256_84, %c0_85] : memref<2688x256xbf16, #tpu.memory_space<vmem>>, vector<128x128xbf16>
    %c0_86 = arith.constant 0 : index
    %c256_87 = arith.constant 256 : index
    %180 = vector.load %arg5[%c0_86, %c256_87] : memref<1x3840xf32, #tpu.memory_space<vmem>>, vector<1x128xf32>
    %181 = arith.truncf %178 : vector<16x128xf32> to vector<16x128xbf16>
    %cst_88 = arith.constant dense<0.000000e+00> : vector<16x128xf32>
    %182 = tpu.matmul %181, %179, %cst_88 {dimension_numbers = #tpu.dot_dimension_numbers<[1], [0], [0], [1], [0, 0, 1, 1], [], []>} : vector<16x128xbf16>, vector<128x128xbf16>, vector<16x128xf32> -> vector<16x128xf32>
    %183 = vector.broadcast %180 : vector<1x128xf32> to vector<16x128xf32>
    %184 = arith.addf %182, %183 : vector<16x128xf32>
    %cst_89 = arith.constant 0.000000e+00 : f32
    %185 = vector.broadcast %cst_89 : f32 to vector<16x128xf32>
    %186 = arith.maximumf %184, %185 : vector<16x128xf32>
    %c384_90 = arith.constant 384 : index
    %c0_91 = arith.constant 0 : index
    %187 = vector.load %arg4[%c384_90, %c0_91] : memref<2688x256xbf16, #tpu.memory_space<vmem>>, vector<128x256xbf16>
    %c0_92 = arith.constant 0 : index
    %c512_93 = arith.constant 512 : index
    %188 = vector.load %arg5[%c0_92, %c512_93] : memref<1x3840xf32, #tpu.memory_space<vmem>>, vector<1x256xf32>
    %189 = arith.truncf %186 : vector<16x128xf32> to vector<16x128xbf16>
    %cst_94 = arith.constant dense<0.000000e+00> : vector<16x256xf32>
    %190 = tpu.matmul %189, %187, %cst_94 {dimension_numbers = #tpu.dot_dimension_numbers<[1], [0], [0], [1], [0, 0, 1, 1], [], []>} : vector<16x128xbf16>, vector<128x256xbf16>, vector<16x256xf32> -> vector<16x256xf32>
    %191 = vector.broadcast %188 : vector<1x256xf32> to vector<16x256xf32>
    %192 = arith.addf %190, %191 : vector<16x256xf32>
    %193 = vector.extract_strided_slice %192 {offsets = [8, 0], sizes = [8, 128], strides = [1, 1]} : vector<16x256xf32> to vector<8x128xf32>
    %194 = vector.extract_strided_slice %192 {offsets = [8, 128], sizes = [8, 128], strides = [1, 1]} : vector<16x256xf32> to vector<8x128xf32>
    %cst_95 = arith.constant 5.000000e-01 : f32
    %195 = vector.broadcast %cst_95 : f32 to vector<8x128xf32>
    %196 = arith.mulf %195, %194 : vector<8x128xf32>
    %197 = math.exp %196 : vector<8x128xf32>
    %198 = arith.mulf %14, %197 : vector<8x128xf32>
    %199 = arith.addf %198, %193 : vector<8x128xf32>
    %200 = tpu.concatenate %142, %11 in 1 : vector<16x256xf32>, vector<16x128xf32> -> vector<16x384xf32>
    %c512_96 = arith.constant 512 : index
    %c0_97 = arith.constant 0 : index
    %201 = vector.load %arg4[%c512_96, %c0_97] : memref<2688x256xbf16, #tpu.memory_space<vmem>>, vector<384x128xbf16>
    %c0_98 = arith.constant 0 : index
    %c768_99 = arith.constant 768 : index
    %202 = vector.load %arg5[%c0_98, %c768_99] : memref<1x3840xf32, #tpu.memory_space<vmem>>, vector<1x128xf32>
    %203 = arith.truncf %200 : vector<16x384xf32> to vector<16x384xbf16>
    %cst_100 = arith.constant dense<0.000000e+00> : vector<16x128xf32>
    %204 = tpu.matmul %203, %201, %cst_100 {dimension_numbers = #tpu.dot_dimension_numbers<[1], [0], [0], [1], [0, 0, 1, 1], [], []>} : vector<16x384xbf16>, vector<384x128xbf16>, vector<16x128xf32> -> vector<16x128xf32>
    %205 = vector.broadcast %202 : vector<1x128xf32> to vector<16x128xf32>
    %206 = arith.addf %204, %205 : vector<16x128xf32>
    %cst_101 = arith.constant 0.000000e+00 : f32
    %207 = vector.broadcast %cst_101 : f32 to vector<16x128xf32>
    %208 = arith.maximumf %206, %207 : vector<16x128xf32>
    %c896_102 = arith.constant 896 : index
    %c0_103 = arith.constant 0 : index
    %209 = vector.load %arg4[%c896_102, %c0_103] : memref<2688x256xbf16, #tpu.memory_space<vmem>>, vector<128x128xbf16>
    %c0_104 = arith.constant 0 : index
    %c1024_105 = arith.constant 1024 : index
    %210 = vector.load %arg5[%c0_104, %c1024_105] : memref<1x3840xf32, #tpu.memory_space<vmem>>, vector<1x128xf32>
    %211 = arith.truncf %208 : vector<16x128xf32> to vector<16x128xbf16>
    %cst_106 = arith.constant dense<0.000000e+00> : vector<16x128xf32>
    %212 = tpu.matmul %211, %209, %cst_106 {dimension_numbers = #tpu.dot_dimension_numbers<[1], [0], [0], [1], [0, 0, 1, 1], [], []>} : vector<16x128xbf16>, vector<128x128xbf16>, vector<16x128xf32> -> vector<16x128xf32>
    %213 = vector.broadcast %210 : vector<1x128xf32> to vector<16x128xf32>
    %214 = arith.addf %212, %213 : vector<16x128xf32>
    %cst_107 = arith.constant 0.000000e+00 : f32
    %215 = vector.broadcast %cst_107 : f32 to vector<16x128xf32>
    %216 = arith.maximumf %214, %215 : vector<16x128xf32>
    %c1024_108 = arith.constant 1024 : index
    %c0_109 = arith.constant 0 : index
    %217 = vector.load %arg4[%c1024_108, %c0_109] : memref<2688x256xbf16, #tpu.memory_space<vmem>>, vector<128x256xbf16>
    %c0_110 = arith.constant 0 : index
    %c1280_111 = arith.constant 1280 : index
    %218 = vector.load %arg5[%c0_110, %c1280_111] : memref<1x3840xf32, #tpu.memory_space<vmem>>, vector<1x256xf32>
    %219 = arith.truncf %216 : vector<16x128xf32> to vector<16x128xbf16>
    %cst_112 = arith.constant dense<0.000000e+00> : vector<16x256xf32>
    %220 = tpu.matmul %219, %217, %cst_112 {dimension_numbers = #tpu.dot_dimension_numbers<[1], [0], [0], [1], [0, 0, 1, 1], [], []>} : vector<16x128xbf16>, vector<128x256xbf16>, vector<16x256xf32> -> vector<16x256xf32>
    %221 = vector.broadcast %218 : vector<1x256xf32> to vector<16x256xf32>
    %222 = arith.addf %220, %221 : vector<16x256xf32>
    %223 = vector.extract_strided_slice %222 {offsets = [8, 0], sizes = [8, 128], strides = [1, 1]} : vector<16x256xf32> to vector<8x128xf32>
    %224 = vector.extract_strided_slice %222 {offsets = [8, 128], sizes = [8, 128], strides = [1, 1]} : vector<16x256xf32> to vector<8x128xf32>
    %cst_113 = arith.constant 5.000000e-01 : f32
    %225 = vector.broadcast %cst_113 : f32 to vector<8x128xf32>
    %226 = arith.mulf %225, %224 : vector<8x128xf32>
    %227 = math.exp %226 : vector<8x128xf32>
    %228 = arith.mulf %17, %227 : vector<8x128xf32>
    %229 = arith.addf %228, %223 : vector<8x128xf32>
    %230 = tpu.concatenate %40, %40 in 0 : vector<8x128xf32>, vector<8x128xf32> -> vector<16x128xf32>
    %231 = tpu.concatenate %41, %41 in 0 : vector<8x128xf32>, vector<8x128xf32> -> vector<16x128xf32>
    %c0_114 = arith.constant 0 : index
    %c0_115 = arith.constant 0 : index
    %232 = vector.load %arg6[%c0_114, %c0_115] : memref<16x1408xf32, #tpu.memory_space<vmem>>, vector<16x128xf32>
    tpu.vector_store %arg6[%c0_114, %c0_115], %49 {strides = array<i32>} : memref<16x1408xf32, #tpu.memory_space<vmem>>, vector<16x128xf32>,
    %c0_116 = arith.constant 0 : index
    %c128 = arith.constant 128 : index
    %233 = vector.load %arg6[%c0_116, %c128] : memref<16x1408xf32, #tpu.memory_space<vmem>>, vector<16x128xf32>
    tpu.vector_store %arg6[%c0_116, %c128], %81 {strides = array<i32>} : memref<16x1408xf32, #tpu.memory_space<vmem>>, vector<16x128xf32>,
    %c0_117 = arith.constant 0 : index
    %c256_118 = arith.constant 256 : index
    %234 = vector.load %arg6[%c0_117, %c256_118] : memref<16x1408xf32, #tpu.memory_space<vmem>>, vector<16x128xf32>
    tpu.vector_store %arg6[%c0_117, %c256_118], %230 {strides = array<i32>} : memref<16x1408xf32, #tpu.memory_space<vmem>>, vector<16x128xf32>,
    %c0_119 = arith.constant 0 : index
    %c384_120 = arith.constant 384 : index
    %235 = vector.load %arg6[%c0_119, %c384_120] : memref<16x1408xf32, #tpu.memory_space<vmem>>, vector<16x128xf32>
    tpu.vector_store %arg6[%c0_119, %c384_120], %231 {strides = array<i32>} : memref<16x1408xf32, #tpu.memory_space<vmem>>, vector<16x128xf32>,
    %c0_121 = arith.constant 0 : index
    %c512_122 = arith.constant 512 : index
    %236 = vector.load %arg6[%c0_121, %c512_122] : memref<16x1408xf32, #tpu.memory_space<vmem>>, vector<16x128xf32>
    tpu.vector_store %arg6[%c0_121, %c512_122], %74 {strides = array<i32>} : memref<16x1408xf32, #tpu.memory_space<vmem>>, vector<16x128xf32>,
    %c0_123 = arith.constant 0 : index
    %c640 = arith.constant 640 : index
    %237 = vector.load %arg6[%c0_123, %c640] : memref<16x1408xf32, #tpu.memory_space<vmem>>, vector<16x128xf32>
    tpu.vector_store %arg6[%c0_123, %c640], %75 {strides = array<i32>} : memref<16x1408xf32, #tpu.memory_space<vmem>>, vector<16x128xf32>,
    %c0_124 = arith.constant 0 : index
    %c768_125 = arith.constant 768 : index
    %238 = vector.load %arg6[%c0_124, %c768_125] : memref<16x1408xf32, #tpu.memory_space<vmem>>, vector<16x128xf32>
    tpu.vector_store %arg6[%c0_124, %c768_125], %104 {strides = array<i32>} : memref<16x1408xf32, #tpu.memory_space<vmem>>, vector<16x128xf32>,
    %c0_126 = arith.constant 0 : index
    %c896_127 = arith.constant 896 : index
    %239 = vector.load %arg6[%c0_126, %c896_127] : memref<16x1408xf32, #tpu.memory_space<vmem>>, vector<16x128xf32>
    tpu.vector_store %arg6[%c0_126, %c896_127], %110 {strides = array<i32>} : memref<16x1408xf32, #tpu.memory_space<vmem>>, vector<16x128xf32>,
    %c0_128 = arith.constant 0 : index
    %c1024_129 = arith.constant 1024 : index
    %240 = vector.load %arg6[%c0_128, %c1024_129] : memref<16x1408xf32, #tpu.memory_space<vmem>>, vector<16x128xf32>
    tpu.vector_store %arg6[%c0_128, %c1024_129], %135 {strides = array<i32>} : memref<16x1408xf32, #tpu.memory_space<vmem>>, vector<16x128xf32>,
    %c0_130 = arith.constant 0 : index
    %c1152_131 = arith.constant 1152 : index
    %241 = vector.load %arg6[%c0_130, %c1152_131] : memref<16x1408xf32, #tpu.memory_space<vmem>>, vector<16x128xf32>
    tpu.vector_store %arg6[%c0_130, %c1152_131], %141 {strides = array<i32>} : memref<16x1408xf32, #tpu.memory_space<vmem>>, vector<16x128xf32>,
    %c0_132 = arith.constant 0 : index
    %c1280_133 = arith.constant 1280 : index
    %242 = vector.load %arg6[%c0_132, %c1280_133] : memref<16x1408xf32, #tpu.memory_space<vmem>>, vector<16x128xf32>
    tpu.vector_store %arg6[%c0_132, %c1280_133], %170 {strides = array<i32>} : memref<16x1408xf32, #tpu.memory_space<vmem>>, vector<16x128xf32>,
    %c0_134 = arith.constant 0 : index
    %c0_135 = arith.constant 0 : index
    %243 = vector.load %arg7[%c0_134, %c0_135] : memref<8x256xf32, #tpu.memory_space<vmem>>, vector<8x128xf32>
    tpu.vector_store %arg7[%c0_134, %c0_135], %199 {strides = array<i32>} : memref<8x256xf32, #tpu.memory_space<vmem>>, vector<8x128xf32>,
    %c0_136 = arith.constant 0 : index
    %c128_137 = arith.constant 128 : index
    %244 = vector.load %arg7[%c0_136, %c128_137] : memref<8x256xf32, #tpu.memory_space<vmem>>, vector<8x128xf32>
    tpu.vector_store %arg7[%c0_136, %c128_137], %229 {strides = array<i32>} : memref<8x256xf32, #tpu.memory_space<vmem>>, vector<8x128xf32>,
    return
  }
}

</mosaic_0001>

<bundles_post_ra>
// kernel: _lambda_.1
= control target key start
LH: loop header
LB: loop body
LE: loop exit
PB: predicated region body
PF: predicated region fallthrough
CT: control target
= control target key end

     0   :  { %v3844_v1 = vmov 0.0   ;;  %vm3845_vm0 = vmmov 0   ;;  %v3846_v60 = vmov 0   ;;  %vm3847_vm2 = vmmov 1   ;;  %s5154_s4 = inlined_call_operand.vmem [shape: bf16[2688,256], index: 4, kind: input, shape index: {}]   ;;  %s5155_s0 = inlined_call_operand.vmem [shape: f32[8,256], index: 0, kind: input, shape index: {}]   ;;  %s5156_s5 = inlined_call_operand.vmem [shape: f32[1,3840], index: 5, kind: input, shape index: {}]   ;;  %s5157_s1 = inlined_call_operand.vmem [shape: f32[8,256], index: 1, kind: input, shape index: {}]   ;;  %s5158_s2 = inlined_call_operand.vmem [shape: f32[8,128], index: 2, kind: input, shape index: {}]   ;;  %s5159_s6 = inlined_call_operand.vmem [shape: f32[16,1408], index: 6, kind: output, shape index: {0}]   ;;  %s5160_s3 = inlined_call_operand.vmem [shape: f32[8,768], index: 3, kind: input, shape index: {}]   ;;  %s5161_s7 = inlined_call_operand.vmem [shape: f32[8,256], index: 7, kind: output, shape index: {1}]  }
   0x1   :  { %v3486_v0 = vld [vmem:[%s5154_s4 + $0x80] ss:$8 sps:$4 sm:$0xff]   ;;  %3242 = vmatprep.subr.bf16.mxu1 %v3844_v1  ;;  %v3488_v3 = vld [vmem:[%s5154_s4 + $0x90] ss:$8 sps:$4 sm:$0xff]   ;;  %3258 = vmatprep.mubr.msk.bf16.mxu1 %vm3845_vm0, %v3844_v1  ;;  %v3512_v30 = vld [vmem:[%s5154_s4 + $0x184] ss:$8 sps:$4 sm:$0xff]  }
   0x2   :  { %v3487_v2 = vld [vmem:[%s5154_s4] ss:$8 sps:$4 sm:$0xff]   ;;  %3002 = vmatprep.subr.bf16.mxu0 %v3486_v0  ;;  %v3489_v4 = vld [vmem:[%s5154_s4 + $0x10] ss:$8 sps:$4 sm:$0xff]   ;;  %v3515_v31 = vld [vmem:[%s5154_s4 + $0x194] ss:$8 sps:$4 sm:$0xff]  }
   0x3   :  { %3003 = vmatpush3.bf16.msra.mxu0 %v3487_v2  ;;  %v3490_v5 = vld [vmem:[%s5154_s4 + $0xa0] ss:$8 sps:$4 sm:$0xff]   ;;  %v3492_v7 = vld [vmem:[%s5154_s4 + $0xb0] ss:$8 sps:$4 sm:$0xff]   ;;  %v3518_v33 = vld [vmem:[%s5154_s4 + $0x1a4] ss:$8 sps:$4 sm:$0xff]  }
   0x4   :  { %3004 = vmatprep.subr.bf16.mxu0 %v3488_v3  ;;  %v3491_v6 = vld [vmem:[%s5154_s4 + $0x20] ss:$8 sps:$4 sm:$0xff]   ;;  %v3493_v8 = vld [vmem:[%s5154_s4 + $0x30] ss:$8 sps:$4 sm:$0xff]   ;;  %v3521_v36 = vld [vmem:[%s5154_s4 + $0x1b4] ss:$8 sps:$4 sm:$0xff]  }
   0x5   :  { %v3494_v9 = vld [vmem:[%s5154_s4 + $0xc0] ss:$8 sps:$4 sm:$0xff]   ;;  %v3496_v11 = vld [vmem:[%s5154_s4 + $0xd0] ss:$8 sps:$4 sm:$0xff]   ;;  %v3524_v38 = vld [vmem:[%s5154_s4 + $0x1c4] ss:$8 sps:$4 sm:$0xff]  }
   0x6   :  { %v3495_v10 = vld [vmem:[%s5154_s4 + $0x40] ss:$8 sps:$4 sm:$0xff]   ;;  %v3497_v15 = vld [vmem:[%s5154_s4 + $0x50] ss:$8 sps:$4 sm:$0xff]   ;;  %v3527_v40 = vld [vmem:[%s5154_s4 + $0x1d4] ss:$8 sps:$4 sm:$0xff]  }
   0x7   :  { %3005 = vmatpush3.bf16.msra.mxu0 %v3489_v4  ;;  %v27_v12 = vld [vmem:[%s5155_s0 + $0x8] sm:$0xff]  ;;  %v3503_v17 = vld [vmem:[%s5154_s4 + $0x110] ss:$8 sps:$4 sm:$0xff]   ;;  %v26_v22 = vld [vmem:[%s5155_s0] sm:$0xff] }
   0x8   :  { %3006 = vmatprep.subr.bf16.mxu0 %v3490_v5  ;;  %v76_v13 = vpack.c.bf16 %v27_v12, %v27_v12  ;;  %v3502_v14 = vld [vmem:[%s5154_s4 + $0x100] ss:$8 sps:$4 sm:$0xff]   ;;  %v3500_v19 = vld [vmem:[%s5154_s4 + $0xf0] ss:$8 sps:$4 sm:$0xff]   ;;  %v75_v24 = vpack.c.bf16 %v26_v22, %v26_v22  ;;  %v3530_v42 = vld [vmem:[%s5154_s4 + $0x1e4] ss:$8 sps:$4 sm:$0xff]  }
   0x9   :  { %v3498_v16 = vld [vmem:[%s5154_s4 + $0xe0] ss:$8 sps:$4 sm:$0xff]   ;;  %3243 = vmatpush3.bf16.msra.mxu1 %v3502_v14  ;;  %v3501_v21 = vld [vmem:[%s5154_s4 + $0x70] ss:$8 sps:$4 sm:$0xff]   ;;  %v3535_v54 = vld [vmem:[%s5154_s4 + $0x1f4] ss:$8 sps:$4 sm:$0xff]  }
   0xa   :  { %211 = vmatprep.mubr.bf16.mxu0 %v76_v13  ;;  %v3499_v18 = vld [vmem:[%s5154_s4 + $0x60] ss:$8 sps:$4 sm:$0xff]   ;;  %3244 = vmatprep.subr.bf16.mxu1 %v3844_v1  ;;  %v3505_v23 = vld [vmem:[%s5154_s4 + $0x130] ss:$8 sps:$4 sm:$0xff]  }
   0xb   :  { %3007 = vmatpush3.bf16.msra.mxu0 %v3491_v6  ;;  %v3504_v20 = vld [vmem:[%s5154_s4 + $0x120] ss:$8 sps:$4 sm:$0xff]   ;;  %v3507_v26 = vld [vmem:[%s5154_s4 + $0x150] ss:$8 sps:$4 sm:$0xff]  }
   0xc   :  { %3008 = vmatprep.subr.bf16.mxu0 %v3492_v7  ;;  %v3506_v25 = vld [vmem:[%s5154_s4 + $0x140] ss:$8 sps:$4 sm:$0xff]   ;;  %v3509_v28 = vld [vmem:[%s5154_s4 + $0x170] ss:$8 sps:$4 sm:$0xff]  }
   0xd   :  { %3245 = vmatpush3.bf16.msra.mxu1 %v3503_v17  ;;  %v3508_v27 = vld [vmem:[%s5154_s4 + $0x160] ss:$8 sps:$4 sm:$0xff]   ;;  %v3513_v32 = vld [vmem:[%s5154_s4 + $0x190] ss:$8 sps:$4 sm:$0xff]  }
   0xe   :  { %3246 = vmatprep.subr.bf16.mxu1 %v3844_v1  ;;  %v3510_v29 = vld [vmem:[%s5154_s4 + $0x180] ss:$8 sps:$4 sm:$0xff]   ;;  %v3519_v37 = vld [vmem:[%s5154_s4 + $0x1b0] ss:$8 sps:$4 sm:$0xff]  }
   0xf   :  { %3009 = vmatpush3.bf16.msra.mxu0 %v3493_v8  ;;  %v3531_v34 = vld [vmem:[%s5154_s4 + $0x280] ss:$8 sps:$4 sm:$0xff]   ;;  %v3525_v41 = vld [vmem:[%s5154_s4 + $0x1d0] ss:$8 sps:$4 sm:$0xff]  }
  0x10   :  { %3010 = vmatprep.subr.bf16.mxu0 %v3494_v9  ;;  %v3516_v35 = vld [vmem:[%s5154_s4 + $0x1a0] ss:$8 sps:$4 sm:$0xff]   ;;  %v3536_v55 = vld [vmem:[%s5154_s4 + $0x290] ss:$8 sps:$4 sm:$0xff]  }
  0x11   :  { %3247 = vmatpush3.bf16.msra.mxu1 %v3504_v20  ;;  %v3522_v39 = vld [vmem:[%s5154_s4 + $0x1c0] ss:$8 sps:$4 sm:$0xff]   ;;  %v3533_v56 = vld [vmem:[%s5154_s4 + $0x1f0] ss:$8 sps:$4 sm:$0xff]  }
  0x12   :  { %3248 = vmatprep.subr.bf16.mxu1 %v3844_v1  ;;  %v3528_v43 = vld [vmem:[%s5154_s4 + $0x1e0] ss:$8 sps:$4 sm:$0xff]   ;;  %v3537_v57 = vld [vmem:[%s5154_s4 + $0x210] ss:$8 sps:$4 sm:$0xff]  }
  0x13   :  { %3011 = vmatpush3.bf16.msra.mxu0 %v3495_v10  ;;  %v2773_v45 = vld [vmem:[%s5156_s5] ss:$0 sm:$0xff]  ;;  %v3541_v61 = vld [vmem:[%s5154_s4 + $0x2b0] ss:$8 sps:$4 sm:$0xff]   ;;  %v29_v8 = vld [vmem:[%s5157_s1 + $0x8] sm:$0xff] }
  0x14   :  { %3012 = vmatprep.subr.bf16.mxu0 %v3496_v11  ;;  %v3532_v52 = vld [vmem:[%s5154_s4 + $0x200] ss:$8 sps:$4 sm:$0xff]   ;;  %v3542_v62 = vld [vmem:[%s5154_s4 + $0x230] ss:$8 sps:$4 sm:$0xff]   ;;  %v540_v10 = vpack.c.bf16 %v29_v8, %v29_v8 }
  0x15   :  { %3249 = vmatpush3.bf16.msra.mxu1 %v3505_v23  ;;  %v3538_v58 = vld [vmem:[%s5154_s4 + $0x2a0] ss:$8 sps:$4 sm:$0xff]   ;;  %v3547_v2 = vld [vmem:[%s5154_s4 + $0x2d0] ss:$8 sps:$4 sm:$0xff]  }
  0x16   :  { %3250 = vmatprep.subr.bf16.mxu1 %v3844_v1  ;;  %v3539_v59 = vld [vmem:[%s5154_s4 + $0x220] ss:$8 sps:$4 sm:$0xff]   ;;  %v3548_v3 = vld [vmem:[%s5154_s4 + $0x250] ss:$8 sps:$4 sm:$0xff]  }
  0x17   :  { %3013 = vmatpush3.bf16.msra.mxu0 %v3497_v15  ;;  %v3544_v63 = vld [vmem:[%s5154_s4 + $0x2c0] ss:$8 sps:$4 sm:$0xff]   ;;  %v3553_v6 = vld [vmem:[%s5154_s4 + $0x2f0] ss:$8 sps:$4 sm:$0xff]  }
  0x18   :  { %3014 = vmatprep.subr.bf16.mxu0 %v3498_v16  ;;  %v3545_v0 = vld [vmem:[%s5154_s4 + $0x240] ss:$8 sps:$4 sm:$0xff]   ;;  %v3554_v7 = vld [vmem:[%s5154_s4 + $0x270] ss:$8 sps:$4 sm:$0xff]  }
  0x19   :  { %3251 = vmatpush3.bf16.msra.mxu1 %v3506_v25  ;;  %v3550_v4 = vld [vmem:[%s5154_s4 + $0x2e0] ss:$8 sps:$4 sm:$0xff]   ;;  %v3549_v23 = vld [vmem:[%s5154_s4 + $0x330] ss:$8 sps:$4 sm:$0xff]  }
  0x1a   :  { %3252 = vmatprep.subr.bf16.mxu1 %v3844_v1  ;;  %v3551_v5 = vld [vmem:[%s5154_s4 + $0x260] ss:$8 sps:$4 sm:$0xff]   ;;  %v3555_v25 = vld [vmem:[%s5154_s4 + $0x350] ss:$8 sps:$4 sm:$0xff]  }
  0x1b   :  { %3015 = vmatpush3.bf16.msra.mxu0 %v3499_v18  ;;  %v28_v9 = vld [vmem:[%s5157_s1] sm:$0xff] }
  0x1c   :  { %3016 = vmatprep.subr.bf16.mxu0 %v3500_v19  ;;  %v539_v11 = vpack.c.bf16 %v28_v9, %v28_v9  ;;  %v2790_v12 = vld [vmem:[%s5156_s5 + $0x2] ss:$0 sm:$0xff] }
  0x1d   :  { %3253 = vmatpush3.bf16.msra.mxu1 %v3507_v26  ;;  %v3540_v19 = vld [vmem:[%s5154_s4 + $0x300] ss:$8 sps:$4 sm:$0xff]   ;;  %v37_v26 = vlaneseq }
  0x1e   :  { %3254 = vmatprep.subr.bf16.mxu1 %v3844_v1  ;;  %v3546_v22 = vld [vmem:[%s5154_s4 + $0x320] ss:$8 sps:$4 sm:$0xff]  }
  0x1f   :  { %3017 = vmatpush3.bf16.msra.mxu0 %v3501_v21  ;;  %v3543_v21 = vld [vmem:[%s5154_s4 + $0x310] ss:$8 sps:$4 sm:$0xff]  }
  0x20   :  { %442 = vmatprep.subr.bf16.mxu0 %v3512_v30 }
  0x21   :  { %3255 = vmatpush3.bf16.msra.mxu1 %v3508_v27  ;;  %v3556_v27 = vld [vmem:[%s5154_s4 + $0x360] ss:$8 sps:$4 sm:$0xff]  }
  0x22   :  { %212 = vmatmul.mubr.bf16.vlgmr.msra.gmra.mrb[0].mxu0 %v75_v24  ;;  %3256 = vmatprep.subr.bf16.mxu1 %v3844_v1  ;;  %v3552_v24 = vld [vmem:[%s5154_s4 + $0x340] ss:$8 sps:$4 sm:$0xff]  }
  0x23   :  { %443 = vmatpush1.bf16.msra.mxu0 %v3510_v29  ;;  %474 = vmatprep.mubr.bf16.mxu0 %v3846_v60  ;;  %v38_v29 = vand.u32 127, %v37_v26 }
  0x24   :  { %444 = vmatprep.subr.bf16.mxu0 %v3515_v31  ;;  %v3557_v31 = vld [vmem:[%s5154_s4 + $0x370] ss:$8 sps:$4 sm:$0xff]  }
  0x25   :  { %3257 = vmatpush3.bf16.msra.mxu1 %v3509_v28  ;;  %v30_v28 = vld [vmem:[%s5158_s2] sm:$0xff]  ;;  %vm39_vm1 = vcmp.lt.s32.totalorder %v38_v29, 1 }
  0x26   :  { %3033 = vmatprep.subr.bf16.mxu1 %v3531_v34  ;;  %v40_v30 = vsub.f32 1.0, %v30_v28  ;;  %vm4128_vm3 = vmpackc.low %vm39_vm1, %vm3847_vm2  ;;  %v3558_v34 = vld [vmem:[%s5154_s4 + $0x380] ss:$8 sps:$4 sm:$0xff]  }
  0x27   :  { %445 = vmatpush1.bf16.msra.mxu0 %v3513_v32 }
  0x28   :  { %446 = vmatprep.subr.bf16.mxu0 %v3518_v33  ;;  %v4126_v32 = vpack.c.bf16 %v40_v30, %v30_v28  ;;  %v3831_v33 = vld [vmem:[%s5154_s4 + $0x420] ss:$8 sps:$4 sm:$0xff]  }
  0x2b   :  { %447 = vmatpush1.bf16.msra.mxu0 %v3516_v35  ;;  %v3559_v35 = vld [vmem:[%s5154_s4 + $0x390] ss:$8 sps:$4 sm:$0xff]  }
  0x2c   :  { %448 = vmatprep.subr.bf16.mxu0 %v3521_v36  ;;  %v3560_v36 = vld [vmem:[%s5154_s4 + $0x3a0] ss:$8 sps:$4 sm:$0xff]  }
  0x2f   :  { %449 = vmatpush1.bf16.msra.mxu0 %v3519_v37  ;;  %v3561_v37 = vld [vmem:[%s5154_s4 + $0x3b0] ss:$8 sps:$4 sm:$0xff]  }
  0x30   :  { %450 = vmatprep.subr.bf16.mxu0 %v3524_v38  ;;  %v3562_v38 = vld [vmem:[%s5154_s4 + $0x3c0] ss:$8 sps:$4 sm:$0xff]  }
  0x33   :  { %451 = vmatpush1.bf16.msra.mxu0 %v3522_v39 }
  0x34   :  { %452 = vmatprep.subr.bf16.mxu0 %v3527_v40 }
  0x37   :  { %453 = vmatpush1.bf16.msra.mxu0 %v3525_v41  ;;  %v3563_v41 = vld [vmem:[%s5154_s4 + $0x3d0] ss:$8 sps:$4 sm:$0xff]  }
  0x38   :  { %454 = vmatprep.subr.bf16.mxu0 %v3530_v42 }
  0x3b   :  { %455 = vmatpush1.bf16.msra.mxu0 %v3528_v43 }
  0x3c   :  { %456 = vmatprep.subr.bf16.mxu0 %v3535_v54  ;;  %v3585_v54 = vld [vmem:[%s5154_s4 + $0x434] ss:$8 sps:$4 sm:$0xff]  }
  0x3f   :  { %457 = vmatpush1.bf16.msra.mxu0 %v3533_v56  ;;  %v3588_v56 = vld [vmem:[%s5154_s4 + $0x444] ss:$8 sps:$4 sm:$0xff]  }
  0x40   :  { %3262 = vmatprep.subr.bf16.mxu0 %v3844_v1 }
  0xf5   :  { %v3018_v44 = vpop.f32.mrb[0].mxu0 }
  0xf6   :  { %v3019_v46 = vpop.f32.mrb[1].mxu0 }
  0xf7   :  { %v3020_v47 = vadd.f32 %v3019_v46, %v3018_v44  ;;  %v3021_v48 = vpop.f32.mrb[2].mxu0  ;;  %v3564_v46 = vld [vmem:[%s5154_s4 + $0x3e0] ss:$8 sps:$4 sm:$0xff]  }
  0xf8   :  { %v3022_v49 = vpop.f32.mrb[3].mxu0  ;;  %v3574_v48 = vld [vmem:[%s5154_s4 + $0x400] ss:$8 sps:$4 sm:$0xff]  }
  0xf9   :  { %v214_v50 = vadd.f32 %v3020_v47, %v2773_v45  ;;  %v3565_v47 = vld [vmem:[%s5154_s4 + $0x3f0] ss:$8 sps:$4 sm:$0xff]   ;;  %v3576_v49 = vld [vmem:[%s5154_s4 + $0x404] ss:$8 sps:$4 sm:$0xff]  }
  0xfb   :  { %v219_v51 = vmax.f32 %v214_v50, 0.0  ;;  %v3579_v50 = vld [vmem:[%s5154_s4 + $0x414] ss:$8 sps:$4 sm:$0xff]  }
  0xfd   :  { %v237_v53 = vpack.c.bf16 %v219_v51, %v219_v51  ;;  %v3577_v51 = vld [vmem:[%s5154_s4 + $0x410] ss:$8 sps:$4 sm:$0xff]  }
  0xff   :  { %3259 = vmatmul.mubr.bf16.vlgmr.msra.gmra.mrb[0].mxu1 %v237_v53  ;;  %v3580_v53 = vld [vmem:[%s5154_s4 + $0x420] ss:$8 sps:$4 sm:$0xff]  }
 0x100   :  { %3034 = vmatpush3.bf16.msra.mxu1 %v3532_v52  ;;  %724 = vmatprep.mubr.bf16.mxu1 %v540_v10  ;;  %v3582_v52 = vld [vmem:[%s5154_s4 + $0x424] ss:$8 sps:$4 sm:$0xff]  }
 0x101   :  { %3035 = vmatprep.subr.bf16.mxu1 %v3536_v55  ;;  %v3583_v55 = vld [vmem:[%s5154_s4 + $0x430] ss:$8 sps:$4 sm:$0xff]  }
 0x104   :  { %3036 = vmatpush3.bf16.msra.mxu1 %v3537_v57  ;;  %v3586_v57 = vld [vmem:[%s5154_s4 + $0x440] ss:$8 sps:$4 sm:$0xff]  }
 0x105   :  { %3037 = vmatprep.subr.bf16.mxu1 %v3538_v58  ;;  %v3591_v58 = vld [vmem:[%s5154_s4 + $0x454] ss:$8 sps:$4 sm:$0xff]  }
 0x108   :  { %3038 = vmatpush3.bf16.msra.mxu1 %v3539_v59  ;;  %v3589_v59 = vld [vmem:[%s5154_s4 + $0x450] ss:$8 sps:$4 sm:$0xff]  }
 0x109   :  { %3039 = vmatprep.subr.bf16.mxu1 %v3541_v61  ;;  %v353_v61 = vshrl.u32 %v37_v26, 7 }
 0x10c   :  { %3040 = vmatpush3.bf16.msra.mxu1 %v3542_v62  ;;  %v4209_v62 = vsub.s32 0, %v353_v61 }
 0x10d   :  { %3041 = vmatprep.subr.bf16.mxu1 %v3544_v63  ;;  %v349_v63 = vld [vmem:[%s5156_s5 + $0x4] sm:$0x3] }
 0x110   :  { %3042 = vmatpush3.bf16.msra.mxu1 %v3545_v0  ;;  %v4214_v0 = vsub.s32 1, %v353_v61  ;;  %v3602_v61 = vld [vmem:[%s5154_s4 + $0x540] ss:$8 sps:$4 sm:$0xff]  }
 0x111   :  { %3043 = vmatprep.subr.bf16.mxu1 %v3547_v2  ;;  %v4217_v2 = vrot.slane %v349_v63, %v4209_v62 }
 0x114   :  { %3044 = vmatpush3.bf16.msra.mxu1 %v3548_v3  ;;  %v4220_v3 = vrot.slane %v349_v63, %v4214_v0  ;;  %v3603_v63 = vld [vmem:[%s5154_s4 + $0x550] ss:$8 sps:$4 sm:$0xff]  }
 0x115   :  { %3045 = vmatprep.subr.bf16.mxu1 %v3550_v4 }
 0x118   :  { %3046 = vmatpush3.bf16.msra.mxu1 %v3551_v5 }
 0x119   :  { %3047 = vmatprep.subr.bf16.mxu1 %v3553_v6 }
 0x11c   :  { %3048 = vmatpush3.bf16.msra.mxu1 %v3554_v7 }
 0x11d   :  { %3282 = vmatprep.subr.bf16.mxu1 %v3844_v1 }
 0x11f   :  { %725 = vmatmul.mubr.bf16.vlgmr.msra.gmra.mrb[4].mxu1 %v539_v11 }
 0x120   :  { %3298 = vmatprep.mubr.msk.bf16.mxu1 %vm3845_vm0, %v3844_v1  ;;  %3283 = vmatpush3.bf16.msra.mxu1 %v3558_v34 }
 0x121   :  { %3284 = vmatprep.subr.bf16.mxu1 %v3844_v1 }
 0x124   :  { %3285 = vmatpush3.bf16.msra.mxu1 %v3559_v35  ;;  %v3567_v35 = vld [vmem:[%s5154_s4 + $0x490] ss:$8 sps:$4 sm:$0xff]  }
 0x125   :  { %3286 = vmatprep.subr.bf16.mxu1 %v3844_v1 }
 0x128   :  { %3287 = vmatpush3.bf16.msra.mxu1 %v3560_v36  ;;  %v3568_v36 = vld [vmem:[%s5154_s4 + $0x4a0] ss:$8 sps:$4 sm:$0xff]  }
 0x129   :  { %3288 = vmatprep.subr.bf16.mxu1 %v3844_v1 }
 0x12c   :  { %3289 = vmatpush3.bf16.msra.mxu1 %v3561_v37  ;;  %v3569_v37 = vld [vmem:[%s5154_s4 + $0x4b0] ss:$8 sps:$4 sm:$0xff]  }
 0x12d   :  { %3290 = vmatprep.subr.bf16.mxu1 %v3844_v1 }
 0x130   :  { %3291 = vmatpush3.bf16.msra.mxu1 %v3562_v38  ;;  %v3570_v38 = vld [vmem:[%s5154_s4 + $0x4c0] ss:$8 sps:$4 sm:$0xff]  }
 0x131   :  { %3292 = vmatprep.subr.bf16.mxu1 %v3844_v1 }
 0x134   :  { %3293 = vmatpush3.bf16.msra.mxu1 %v3563_v41  ;;  %v3573_v41 = vld [vmem:[%s5154_s4 + $0x4f0] ss:$8 sps:$4 sm:$0xff]  }
 0x135   :  { %3294 = vmatprep.subr.bf16.mxu1 %v3844_v1 }
 0x138   :  { %3295 = vmatpush3.bf16.msra.mxu1 %v3564_v46  ;;  %v2843_v46 = vld [vmem:[%s5156_s5 + $0x8] ss:$0 sm:$0xff] }
 0x139   :  { %3296 = vmatprep.subr.bf16.mxu1 %v3844_v1 }
 0x13c   :  { %3297 = vmatpush3.bf16.msra.mxu1 %v3565_v47 }
 0x13d   :  { %3302 = vmatprep.subr.bf16.mxu1 %v3844_v1 }
 0x1d2   :  { %v326_v13 = vpop.f32.mrb[0].mxu1 }
 0x1d3   :  { %v327_v14 = vadd.f32 %v2790_v12, %v326_v13  ;;  %v3260_v15 = vpop.f32.mrb[1].mxu1  ;;  %v31_v12 = vld [vmem:[%s5160_s3] sm:$0xff]  ;;  %v32_v13 = vld [vmem:[%s5160_s3 + $0x8] sm:$0xff] }
 0x1d4   :  { %v329_v16 = vpop.f32.mrb[2].mxu1 }
 0x1d5   :  { %v332_v17 = vmax.f32 %v327_v14, 0.0  ;;  %v3261_v18 = vpop.f32.mrb[3].mxu1 }
 0x1d7   :  { %v350_v20 = vpack.c.bf16 %v332_v17, %v332_v17 }
 0x1d9   :  { %475 = vmatmul.mubr.bf16.vlgmr.msra.gmra.mrb[4].mxu0 %v350_v20  ;;  %v2815_v20 = vld [vmem:[%s5156_s5 + $0x6] ss:$0 sm:$0xff] }
 0x1da   :  { %3263 = vmatpush3.bf16.msra.mxu0 %v3540_v19  ;;  %3278 = vmatprep.mubr.msk.bf16.mxu0 %vm3845_vm0, %v3844_v1 }
 0x1db   :  { %3264 = vmatprep.subr.bf16.mxu0 %v3844_v1 }
 0x1de   :  { %3265 = vmatpush3.bf16.msra.mxu0 %v3543_v21 }
 0x1df   :  { %3266 = vmatprep.subr.bf16.mxu0 %v3844_v1 }
 0x1e2   :  { %3267 = vmatpush3.bf16.msra.mxu0 %v3546_v22 }
 0x1e3   :  { %3268 = vmatprep.subr.bf16.mxu0 %v3844_v1 }
 0x1e6   :  { %3269 = vmatpush3.bf16.msra.mxu0 %v3549_v23 }
 0x1e7   :  { %3270 = vmatprep.subr.bf16.mxu0 %v3844_v1 }
 0x1ea   :  { %3271 = vmatpush3.bf16.msra.mxu0 %v3552_v24 }
 0x1eb   :  { %3272 = vmatprep.subr.bf16.mxu0 %v3844_v1 }
 0x1ee   :  { %3273 = vmatpush3.bf16.msra.mxu0 %v3555_v25 }
 0x1ef   :  { %3274 = vmatprep.subr.bf16.mxu0 %v3844_v1 }
 0x1f2   :  { %3275 = vmatpush3.bf16.msra.mxu0 %v3556_v27  ;;  %v3049_v39 = vpop.f32.mrb[4].mxu1 }
 0x1f3   :  { %3276 = vmatprep.subr.bf16.mxu0 %v3844_v1  ;;  %v3050_v40 = vpop.f32.mrb[5].mxu1 }
 0x1f4   :  { %v4158_v42 = vadd.f32 %v3050_v40, %v3049_v39  ;;  %v3052_v43 = vpop.f32.mrb[6].mxu1  ;;  %v3571_v39 = vld [vmem:[%s5154_s4 + $0x4d0] ss:$8 sps:$4 sm:$0xff]   ;;  %v3572_v40 = vld [vmem:[%s5154_s4 + $0x4e0] ss:$8 sps:$4 sm:$0xff]  }
 0x1f5   :  { %v3053_v44 = vpop.f32.mrb[7].mxu1 }
 0x1f6   :  { %3277 = vmatpush3.bf16.msra.mxu0 %v3557_v31  ;;  %v4161_v45 = vadd.f32 %v3053_v44, %v3052_v43  ;;  %v727_v21 = vadd.f32 %v4158_v42, %v2815_v20  ;;  %v3566_v31 = vld [vmem:[%s5154_s4 + $0x480] ss:$8 sps:$4 sm:$0xff]   ;;  %v3594_v42 = vld [vmem:[%s5154_s4 + $0x464] ss:$8 sps:$4 sm:$0xff]   ;;  %v3597_v44 = vld [vmem:[%s5154_s4 + $0x474] ss:$8 sps:$4 sm:$0xff]  }
 0x1f7   :  { %1000 = vmatprep.subr.bf16.mxu0 %v3576_v49  ;;  %v3592_v43 = vld [vmem:[%s5154_s4 + $0x460] ss:$8 sps:$4 sm:$0xff]  }
 0x1f8   :  { %v730_v25 = vadd.f32 %v4161_v45, %v2815_v20  ;;  %v3595_v45 = vld [vmem:[%s5154_s4 + $0x470] ss:$8 sps:$4 sm:$0xff]  }
 0x1f9   :  { %3279 = vmatmul.mubr.msk.bf16.vlgmr.msra.gmra.mrb[8].mxu0 %vm4128_vm3, %v4126_v32  ;;  %v3609_v20 = vld [vmem:[%s5154_s4 + $0x610] ss:$8 sps:$4 sm:$0xff]  }
 0x1fa   :  { %1032 = vmatprep.mubr.bf16.mxu0 %v3846_v60  ;;  %1001 = vmatpush1.bf16.msra.mxu0 %v3574_v48 }
 0x1fb   :  { %1002 = vmatprep.subr.bf16.mxu0 %v3579_v50 }
 0x1fe   :  { %1003 = vmatpush1.bf16.msra.mxu0 %v3577_v51 }
 0x1ff   :  { %1004 = vmatprep.subr.bf16.mxu0 %v3582_v52 }
 0x202   :  { %1005 = vmatpush1.bf16.msra.mxu0 %v3580_v53 }
 0x203   :  { %1006 = vmatprep.subr.bf16.mxu0 %v3585_v54 }
 0x206   :  { %1007 = vmatpush1.bf16.msra.mxu0 %v3583_v55  ;;  %v3598_v55 = vld [vmem:[%s5154_s4 + $0x500] ss:$8 sps:$4 sm:$0xff]  }
 0x207   :  { %1008 = vmatprep.subr.bf16.mxu0 %v3588_v56 }
 0x20a   :  { %1009 = vmatpush1.bf16.msra.mxu0 %v3586_v57  ;;  %v3599_v57 = vld [vmem:[%s5154_s4 + $0x510] ss:$8 sps:$4 sm:$0xff]  }
 0x20b   :  { %1010 = vmatprep.subr.bf16.mxu0 %v3591_v58  ;;  %v3600_v58 = vld [vmem:[%s5154_s4 + $0x520] ss:$8 sps:$4 sm:$0xff]  }
 0x20e   :  { %1011 = vmatpush1.bf16.msra.mxu0 %v3589_v59  ;;  %v3601_v59 = vld [vmem:[%s5154_s4 + $0x530] ss:$8 sps:$4 sm:$0xff]  }
 0x20f   :  { %1012 = vmatprep.subr.bf16.mxu0 %v3594_v42  ;;  %v3635_v42 = vld [vmem:[%s5154_s4 + $0x5c4] ss:$8 sps:$4 sm:$0xff]  }
 0x212   :  { %1013 = vmatpush1.bf16.msra.mxu0 %v3592_v43  ;;  %v3636_v43 = vld [vmem:[%s5154_s4 + $0x670] ss:$8 sps:$4 sm:$0xff]  }
 0x213   :  { %1014 = vmatprep.subr.bf16.mxu0 %v3597_v44  ;;  %v3633_v44 = vld [vmem:[%s5154_s4 + $0x5c0] ss:$8 sps:$4 sm:$0xff]  }
 0x216   :  { %1015 = vmatpush1.bf16.msra.mxu0 %v3595_v45  ;;  %v3637_v45 = vld [vmem:[%s5154_s4 + $0x5d0] ss:$8 sps:$4 sm:$0xff]  }
 0x217   :  { %3322 = vmatprep.subr.bf16.mxu0 %v3844_v1 }
 0x2ac   :  { %v476_v4 = vpop.f32.mrb[4].mxu0 }
 0x2ad   :  { %v477_v5 = vadd.f32 %v476_v4, %v4217_v2  ;;  %v478_v6 = vpop.f32.mrb[5].mxu0  ;;  %v2868_v4 = vld [vmem:[%s5156_s5 + $0xc] ss:$0 sm:$0xff] }
 0x2ae   :  { %v479_v7 = vadd.f32 %v478_v6, %v4220_v3  ;;  %v480_v8 = vpop.f32.mrb[6].mxu0 }
 0x2af   :  { %2745 = vst [vmem:[%s5159_s6 + $0x10] sm:$0xff] %v477_v5  ;;  %2746 = vst [vmem:[%s5159_s6 + $0x68] sm:$0xff] %v477_v5  ;;  %v481_v9 = vpop.f32.mrb[7].mxu0 }
 0x2b0   :  { %v483_v10 = vmul.f32 0.5, %v479_v7  ;;  %2747 = vst [vmem:[%s5159_s6 + $0x18] sm:$0xff] %v479_v7  ;;  %2748 = vst [vmem:[%s5159_s6 + $0x70] sm:$0xff] %v479_v7 }
 0x2b2   :  { %v484_v11 = vmul.f32 1.442695, %v483_v10  ;;  %v3605_v10 = vld [vmem:[%s5154_s4 + $0x570] ss:$8 sps:$4 sm:$0xff]  }
 0x2b4   :  { %3718 = vpow2.f32 %v484_v11 }
 0x2be   :  { %v3719_v14 = vpop.eup %3718 }
 0x2bf   :  { %v486_v15 = vmul.f32 %v3719_v14, %v31_v12  ;;  %v488_v16 = vmul.f32 %v3719_v14, %v32_v13  ;;  %v3606_v13 = vld [vmem:[%s5154_s4 + $0x680] ss:$8 sps:$4 sm:$0xff]  }
 0x2c1   :  { %v487_v17 = vadd.f32 %v486_v15, %v477_v5  ;;  %v489_v18 = vadd.f32 %v488_v16, %v477_v5  ;;  %v3604_v5 = vld [vmem:[%s5154_s4 + $0x560] ss:$8 sps:$4 sm:$0xff]  }
 0x2c2   :  { %v3607_v16 = vld [vmem:[%s5154_s4 + $0x600] ss:$8 sps:$4 sm:$0xff]  }
 0x2c3   :  { %v4242_v19 = vpack.c.bf16 %v489_v18, %v487_v17  ;;  %2741 = vst [vmem:[%s5159_s6] sm:$0xff] %v487_v17  ;;  %2742 = vst [vmem:[%s5159_s6 + $0x58] sm:$0xff] %v489_v18  ;;  %v3608_v18 = vld [vmem:[%s5154_s4 + $0x690] ss:$8 sps:$4 sm:$0xff]  }
 0x2cc   :  { %v767_v22 = vpop.f32.mrb[8].mxu0 }
 0x2cd   :  { %v768_v23 = vadd.f32 %v767_v22, %v727_v21  ;;  %v3280_v24 = vpop.f32.mrb[9].mxu0  ;;  %v3610_v21 = vld [vmem:[%s5154_s4 + $0x6a0] ss:$8 sps:$4 sm:$0xff]  }
 0x2ce   :  { %v770_v26 = vpop.f32.mrb[10].mxu0  ;;  %v3611_v22 = vld [vmem:[%s5154_s4 + $0x620] ss:$8 sps:$4 sm:$0xff]   ;;  %v3615_v24 = vld [vmem:[%s5154_s4 + $0x584] ss:$8 sps:$4 sm:$0xff]  }
 0x2cf   :  { %v771_v27 = vadd.f32 %v770_v26, %v730_v25  ;;  %v3281_v28 = vpop.f32.mrb[11].mxu0  ;;  %v774_v29 = vmax.f32 %v768_v23, 0.0  ;;  %v3612_v23 = vld [vmem:[%s5154_s4 + $0x6b0] ss:$8 sps:$4 sm:$0xff]   ;;  %v3613_v26 = vld [vmem:[%s5154_s4 + $0x580] ss:$8 sps:$4 sm:$0xff]  }
 0x2d0   :  { %v3616_v25 = vld [vmem:[%s5154_s4 + $0x630] ss:$8 sps:$4 sm:$0xff]  }
 0x2d1   :  { %v775_v30 = vmax.f32 %v771_v27, 0.0  ;;  %v3617_v27 = vld [vmem:[%s5154_s4 + $0x6c0] ss:$8 sps:$4 sm:$0xff]   ;;  %v3618_v28 = vld [vmem:[%s5154_s4 + $0x590] ss:$8 sps:$4 sm:$0xff]  }
 0x2d3   :  { %v793_v34 = vpack.c.bf16 %v775_v30, %v774_v29  ;;  %v3620_v29 = vld [vmem:[%s5154_s4 + $0x594] ss:$8 sps:$4 sm:$0xff]   ;;  %v3621_v30 = vld [vmem:[%s5154_s4 + $0x640] ss:$8 sps:$4 sm:$0xff]  }
 0x2d5   :  { %3299 = vmatmul.mubr.bf16.vlgmr.msra.gmra.mrb[8].mxu1 %v793_v34  ;;  %v3625_v34 = vld [vmem:[%s5154_s4 + $0x5a4] ss:$8 sps:$4 sm:$0xff]  }
 0x2d6   :  { %3303 = vmatpush3.bf16.msra.mxu1 %v3566_v31  ;;  %3318 = vmatprep.mubr.msk.bf16.mxu1 %vm3845_vm0, %v3844_v1  ;;  %v3622_v31 = vld [vmem:[%s5154_s4 + $0x6d0] ss:$8 sps:$4 sm:$0xff]  }
 0x2d7   :  { %3304 = vmatprep.subr.bf16.mxu1 %v3844_v1 }
 0x2da   :  { %3305 = vmatpush3.bf16.msra.mxu1 %v3567_v35  ;;  %v3626_v35 = vld [vmem:[%s5154_s4 + $0x650] ss:$8 sps:$4 sm:$0xff]  }
 0x2db   :  { %3306 = vmatprep.subr.bf16.mxu1 %v3844_v1 }
 0x2de   :  { %3307 = vmatpush3.bf16.msra.mxu1 %v3568_v36  ;;  %v3623_v36 = vld [vmem:[%s5154_s4 + $0x5a0] ss:$8 sps:$4 sm:$0xff]  }
 0x2df   :  { %3308 = vmatprep.subr.bf16.mxu1 %v3844_v1 }
 0x2e2   :  { %3309 = vmatpush3.bf16.msra.mxu1 %v3569_v37  ;;  %v3627_v37 = vld [vmem:[%s5154_s4 + $0x6e0] ss:$8 sps:$4 sm:$0xff]  }
 0x2e3   :  { %3310 = vmatprep.subr.bf16.mxu1 %v3844_v1 }
 0x2e6   :  { %3311 = vmatpush3.bf16.msra.mxu1 %v3570_v38  ;;  %v3630_v38 = vld [vmem:[%s5154_s4 + $0x5b4] ss:$8 sps:$4 sm:$0xff]  }
 0x2e7   :  { %3312 = vmatprep.subr.bf16.mxu1 %v3844_v1 }
 0x2ea   :  { %3313 = vmatpush3.bf16.msra.mxu1 %v3571_v39  ;;  %v3631_v39 = vld [vmem:[%s5154_s4 + $0x660] ss:$8 sps:$4 sm:$0xff]  }
 0x2eb   :  { %3314 = vmatprep.subr.bf16.mxu1 %v3844_v1 }
 0x2ee   :  { %3315 = vmatpush3.bf16.msra.mxu1 %v3572_v40  ;;  %v3628_v40 = vld [vmem:[%s5154_s4 + $0x5b0] ss:$8 sps:$4 sm:$0xff]  }
 0x2ef   :  { %3316 = vmatprep.subr.bf16.mxu1 %v3844_v1 }
 0x2f2   :  { %3317 = vmatpush3.bf16.msra.mxu1 %v3573_v41  ;;  %v3632_v41 = vld [vmem:[%s5154_s4 + $0x6f0] ss:$8 sps:$4 sm:$0xff]  }
 0x2f3   :  { %1392 = vmatprep.subr.bf16.mxu1 %v3615_v24 }
 0x2f5   :  { %3319 = vmatmul.mubr.bf16.vlgmr.msra.gmra.mrb[12].mxu1 %v4242_v19 }
 0x2f6   :  { %1424 = vmatprep.mubr.bf16.mxu1 %v3846_v60  ;;  %1393 = vmatpush1.bf16.msra.mxu1 %v3613_v26 }
 0x2f7   :  { %1394 = vmatprep.subr.bf16.mxu1 %v3620_v29  ;;  %v3647_v29 = vld [vmem:[%s5154_s4 + $0x710] ss:$8 sps:$4 sm:$0xff]  }
 0x2fa   :  { %1395 = vmatpush1.bf16.msra.mxu1 %v3618_v28 }
 0x2fb   :  { %1396 = vmatprep.subr.bf16.mxu1 %v3625_v34  ;;  %v3650_v34 = vld [vmem:[%s5154_s4 + $0x740] ss:$8 sps:$4 sm:$0xff]  }
 0x2fe   :  { %1397 = vmatpush1.bf16.msra.mxu1 %v3623_v36  ;;  %v3652_v36 = vld [vmem:[%s5154_s4 + $0x760] ss:$8 sps:$4 sm:$0xff]  }
 0x2ff   :  { %1398 = vmatprep.subr.bf16.mxu1 %v3630_v38  ;;  %v3654_v38 = vld [vmem:[%s5154_s4 + $0x880] ss:$8 sps:$4 sm:$0xff]  }
 0x302   :  { %1399 = vmatpush1.bf16.msra.mxu1 %v3628_v40  ;;  %v3672_v40 = vld [vmem:[%s5154_s4 + $0x784] ss:$8 sps:$4 sm:$0xff]  }
 0x303   :  { %1400 = vmatprep.subr.bf16.mxu1 %v3635_v42  ;;  %v3673_v42 = vld [vmem:[%s5154_s4 + $0x790] ss:$8 sps:$4 sm:$0xff]  }
 0x306   :  { %1401 = vmatpush1.bf16.msra.mxu1 %v3633_v44  ;;  %v3676_v44 = vld [vmem:[%s5154_s4 + $0x7a0] ss:$8 sps:$4 sm:$0xff]  }
 0x3a8   :  { %v882_v47 = vpop.f32.mrb[8].mxu1 }
 0x3a9   :  { %v883_v48 = vadd.f32 %v2843_v46, %v882_v47  ;;  %v3300_v49 = vpop.f32.mrb[9].mxu1  ;;  %v3642_v47 = vld [vmem:[%s5154_s4 + $0x5e4] ss:$8 sps:$4 sm:$0xff]  }
 0x3aa   :  { %v885_v50 = vpop.f32.mrb[10].mxu1  ;;  %v3645_v49 = vld [vmem:[%s5154_s4 + $0x5f4] ss:$8 sps:$4 sm:$0xff]  }
 0x3ab   :  { %v886_v51 = vadd.f32 %v2843_v46, %v885_v50  ;;  %v3301_v52 = vpop.f32.mrb[11].mxu1  ;;  %v889_v53 = vmax.f32 %v883_v48, 0.0  ;;  %v3639_v46 = vld [vmem:[%s5154_s4 + $0x5d4] ss:$8 sps:$4 sm:$0xff]   ;;  %v3640_v48 = vld [vmem:[%s5154_s4 + $0x5e0] ss:$8 sps:$4 sm:$0xff]  }
 0x3ac   :  { %1402 = vmatprep.subr.bf16.mxu1 %v3639_v46  ;;  %v3643_v50 = vld [vmem:[%s5154_s4 + $0x5f0] ss:$8 sps:$4 sm:$0xff]  }
 0x3ad   :  { %v890_v54 = vmax.f32 %v886_v51, 0.0  ;;  %1403 = vmatpush1.bf16.msra.mxu1 %v3637_v45  ;;  %v907_v51 = vld [vmem:[%s5156_s5 + $0xa] sm:$0x3]  ;;  %v3681_v45 = vld [vmem:[%s5154_s4 + $0x7b4] ss:$8 sps:$4 sm:$0xff]  }
 0x3ae   :  { %1404 = vmatprep.subr.bf16.mxu1 %v3642_v47  ;;  %v4446_v52 = vrot.slane %v907_v51, %v4209_v62  ;;  %v3679_v46 = vld [vmem:[%s5154_s4 + $0x7b0] ss:$8 sps:$4 sm:$0xff]   ;;  %v3684_v47 = vld [vmem:[%s5154_s4 + $0x7c4] ss:$8 sps:$4 sm:$0xff]  }
 0x3af   :  { %v908_v56 = vpack.c.bf16 %v890_v54, %v889_v53  ;;  %v4449_v53 = vrot.slane %v907_v51, %v4214_v0 }
 0x3b1   :  { %1033 = vmatmul.mubr.bf16.vlgmr.msra.gmra.mrb[12].mxu0 %v908_v56  ;;  %1405 = vmatpush1.bf16.msra.mxu1 %v3640_v48  ;;  %v3682_v48 = vld [vmem:[%s5154_s4 + $0x7c0] ss:$8 sps:$4 sm:$0xff]  }
 0x3b2   :  { %3323 = vmatpush3.bf16.msra.mxu0 %v3598_v55  ;;  %3338 = vmatprep.mubr.msk.bf16.mxu0 %vm3845_vm0, %v3844_v1 }
 0x3b3   :  { %3324 = vmatprep.subr.bf16.mxu0 %v3844_v1  ;;  %1406 = vmatprep.subr.bf16.mxu1 %v3645_v49  ;;  %v3687_v49 = vld [vmem:[%s5154_s4 + $0x7d4] ss:$8 sps:$4 sm:$0xff]  }
 0x3b5   :  { %1407 = vmatpush1.bf16.msra.mxu1 %v3643_v50  ;;  %v3685_v50 = vld [vmem:[%s5154_s4 + $0x7d0] ss:$8 sps:$4 sm:$0xff]  }
 0x3b6   :  { %3325 = vmatpush3.bf16.msra.mxu0 %v3599_v57  ;;  %3342 = vmatprep.subr.bf16.mxu1 %v3844_v1 }
 0x3b7   :  { %3326 = vmatprep.subr.bf16.mxu0 %v3844_v1 }
 0x3ba   :  { %3327 = vmatpush3.bf16.msra.mxu0 %v3600_v58 }
 0x3bb   :  { %3328 = vmatprep.subr.bf16.mxu0 %v3844_v1 }
 0x3be   :  { %3329 = vmatpush3.bf16.msra.mxu0 %v3601_v59 }
 0x3bf   :  { %3330 = vmatprep.subr.bf16.mxu0 %v3844_v1 }
 0x3c2   :  { %3331 = vmatpush3.bf16.msra.mxu0 %v3602_v61 }
 0x3c3   :  { %3332 = vmatprep.subr.bf16.mxu0 %v3844_v1 }
 0x3c6   :  { %3333 = vmatpush3.bf16.msra.mxu0 %v3603_v63 }
 0x3c7   :  { %3334 = vmatprep.subr.bf16.mxu0 %v3844_v1 }
 0x3c8   :  { %v1159_v6 = vpop.f32.mrb[12].mxu1 }
 0x3c9   :  { %v1160_v7 = vadd.f32 %v2868_v4, %v1159_v6  ;;  %v3320_v8 = vpop.f32.mrb[13].mxu1 }
 0x3ca   :  { %v1162_v9 = vpop.f32.mrb[14].mxu1  ;;  %3335 = vmatpush3.bf16.msra.mxu0 %v3604_v5  ;;  %v34_v8 = vld [vmem:[%s5160_s3 + $0x18] sm:$0xff] }
 0x3cb   :  { %v1163_v11 = vadd.f32 %v2868_v4, %v1162_v9  ;;  %v3321_v12 = vpop.f32.mrb[15].mxu1  ;;  %3336 = vmatprep.subr.bf16.mxu0 %v3844_v1  ;;  %v1166_v14 = vmax.f32 %v1160_v7, 0.0 }
 0x3cd   :  { %v1167_v15 = vmax.f32 %v1163_v11, 0.0 }
 0x3ce   :  { %3337 = vmatpush3.bf16.msra.mxu0 %v3605_v10  ;;  %v35_v10 = vld [vmem:[%s5160_s3 + $0x20] sm:$0xff] }
 0x3cf   :  { %v1185_v17 = vpack.c.bf16 %v1167_v15, %v1166_v14  ;;  %3091 = vmatprep.subr.bf16.mxu0 %v3606_v13 }
 0x3d1   :  { %3339 = vmatmul.mubr.bf16.vlgmr.msra.gmra.mrb[16].mxu0 %v1185_v17  ;;  %v2877_v17 = vld [vmem:[%s5156_s5 + $0xe] ss:$0 sm:$0xff] }
 0x3d2   :  { %3092 = vmatpush3.bf16.msra.mxu0 %v3607_v16  ;;  %2923 = vmatprep.mubr.msk.bf16.mxu0 %vm4128_vm3, %v4126_v32 }
 0x3d3   :  { %3093 = vmatprep.subr.bf16.mxu0 %v3608_v18 }
 0x3d6   :  { %3094 = vmatpush3.bf16.msra.mxu0 %v3609_v20 }
 0x3d7   :  { %3095 = vmatprep.subr.bf16.mxu0 %v3610_v21 }
 0x3da   :  { %3096 = vmatpush3.bf16.msra.mxu0 %v3611_v22 }
 0x3db   :  { %3097 = vmatprep.subr.bf16.mxu0 %v3612_v23 }
 0x3de   :  { %3098 = vmatpush3.bf16.msra.mxu0 %v3616_v25 }
 0x3df   :  { %3099 = vmatprep.subr.bf16.mxu0 %v3617_v27  ;;  %v3646_v27 = vld [vmem:[%s5154_s4 + $0x700] ss:$8 sps:$4 sm:$0xff]  }
 0x3e2   :  { %3100 = vmatpush3.bf16.msra.mxu0 %v3621_v30  ;;  %v3648_v30 = vld [vmem:[%s5154_s4 + $0x720] ss:$8 sps:$4 sm:$0xff]  }
 0x3e3   :  { %3101 = vmatprep.subr.bf16.mxu0 %v3622_v31  ;;  %v3649_v31 = vld [vmem:[%s5154_s4 + $0x730] ss:$8 sps:$4 sm:$0xff]  }
 0x3e6   :  { %3102 = vmatpush3.bf16.msra.mxu0 %v3626_v35  ;;  %v3651_v35 = vld [vmem:[%s5154_s4 + $0x750] ss:$8 sps:$4 sm:$0xff]  }
 0x3e7   :  { %3103 = vmatprep.subr.bf16.mxu0 %v3627_v37  ;;  %v3653_v37 = vld [vmem:[%s5154_s4 + $0x770] ss:$8 sps:$4 sm:$0xff]  }
 0x3ea   :  { %3104 = vmatpush3.bf16.msra.mxu0 %v3631_v39  ;;  %v3670_v39 = vld [vmem:[%s5154_s4 + $0x780] ss:$8 sps:$4 sm:$0xff]  }
 0x3eb   :  { %3105 = vmatprep.subr.bf16.mxu0 %v3632_v41  ;;  %v3675_v41 = vld [vmem:[%s5154_s4 + $0x794] ss:$8 sps:$4 sm:$0xff]  }
 0x3ee   :  { %3106 = vmatpush3.bf16.msra.mxu0 %v3636_v43  ;;  %v3678_v43 = vld [vmem:[%s5154_s4 + $0x7a4] ss:$8 sps:$4 sm:$0xff]  }
 0x3ef   :  { %1850 = vmatprep.subr.bf16.mxu0 %v3672_v40  ;;  %v3667_v40 = vld [vmem:[%s5154_s4 + $0x860] ss:$8 sps:$4 sm:$0xff]  }
 0x484   :  { %v1034_v54 = vpop.f32.mrb[12].mxu0 }
 0x485   :  { %v1035_v55 = vadd.f32 %v1034_v54, %v4446_v52  ;;  %v1036_v56 = vpop.f32.mrb[13].mxu0  ;;  %v2904_v54 = vld [vmem:[%s5156_s5 + $0x12] ss:$0 sm:$0xff] }
 0x486   :  { %v1037_v57 = vadd.f32 %v1036_v56, %v4449_v53  ;;  %v1038_v58 = vpop.f32.mrb[14].mxu0 }
 0x487   :  { %2749 = vst [vmem:[%s5159_s6 + $0x20] sm:$0xff] %v1035_v55  ;;  %v1039_v59 = vadd.f32 %v1038_v58, %v4446_v52  ;;  %v1040_v61 = vpop.f32.mrb[15].mxu0 }
 0x488   :  { %v1043_v63 = vmul.f32 0.5, %v1037_v57  ;;  %2751 = vst [vmem:[%s5159_s6 + $0x28] sm:$0xff] %v1037_v57  ;;  %v1041_v4 = vadd.f32 %v1040_v61, %v4449_v53 }
 0x489   :  { %2750 = vst [vmem:[%s5159_s6 + $0x78] sm:$0xff] %v1039_v59 }
 0x48a   :  { %v1045_v5 = vmul.f32 1.442695, %v1043_v63  ;;  %v1044_v6 = vmul.f32 0.5, %v1041_v4  ;;  %2752 = vst [vmem:[%s5159_s6 + $0x80] sm:$0xff] %v1041_v4 }
 0x48c   :  { %3720 = vpow2.f32 %v1045_v5  ;;  %v1047_v7 = vmul.f32 1.442695, %v1044_v6  ;;  %v1299_v6 = vld [vmem:[%s5156_s5 + $0x10] sm:$0x3] }
 0x48e   :  { %3722 = vpow2.f32 %v1047_v7  ;;  %v3655_v7 = vld [vmem:[%s5154_s4 + $0x800] ss:$8 sps:$4 sm:$0xff]  }
 0x496   :  { %v3721_v9 = vpop.eup %3720 }
 0x497   :  { %v1049_v11 = vmul.f32 %v3721_v9, %v34_v8  ;;  %v3656_v9 = vld [vmem:[%s5154_s4 + $0x890] ss:$8 sps:$4 sm:$0xff]  }
 0x498   :  { %v3723_v12 = vpop.eup %3722 }
 0x499   :  { %v1050_v13 = vmul.f32 %v3723_v12, %v35_v10  ;;  %v1051_v14 = vadd.f32 %v1049_v11, %v1035_v55  ;;  %v1305_v10 = vrot.slane %v1299_v6, %v4209_v62  ;;  %v1309_v11 = vrot.slane %v1299_v6, %v4214_v0  ;;  %v3657_v12 = vld [vmem:[%s5154_s4 + $0x810] ss:$8 sps:$4 sm:$0xff]  }
 0x49a   :  { %v3697_v6 = vld [vmem:[%s5154_s4 + $0x930] ss:$8 sps:$4 sm:$0xff]  }
 0x49b   :  { %v1052_v15 = vadd.f32 %v1050_v13, %v1039_v59  ;;  %2743 = vst [vmem:[%s5159_s6 + $0x8] sm:$0xff] %v1051_v14 }
 0x49d   :  { %v4476_v16 = vpack.c.bf16 %v1052_v15, %v1051_v14  ;;  %2744 = vst [vmem:[%s5159_s6 + $0x60] sm:$0xff] %v1052_v15  ;;  %v3658_v14 = vld [vmem:[%s5154_s4 + $0x8a0] ss:$8 sps:$4 sm:$0xff]  }
 0x49f   :  { %1616 = vmatmul.mubr.bf16.vlgmr.msra.gmra.mrb[20].mxu0 %v4476_v16 }
 0x4a0   :  { %1882 = vmatprep.mubr.bf16.mxu0 %v3846_v60  ;;  %1851 = vmatpush1.bf16.msra.mxu0 %v3670_v39 }
 0x4a1   :  { %1852 = vmatprep.subr.bf16.mxu0 %v3675_v41  ;;  %v3668_v41 = vld [vmem:[%s5154_s4 + $0x8f0] ss:$8 sps:$4 sm:$0xff]  }
 0x4a4   :  { %v1274_v18 = vpop.f32.mrb[16].mxu0  ;;  %1853 = vmatpush1.bf16.msra.mxu0 %v3673_v42  ;;  %v3669_v42 = vld [vmem:[%s5154_s4 + $0x870] ss:$8 sps:$4 sm:$0xff]  }
 0x4a5   :  { %v1275_v20 = vadd.f32 %v2877_v17, %v1274_v18  ;;  %v3340_v21 = vpop.f32.mrb[17].mxu0  ;;  %1854 = vmatprep.subr.bf16.mxu0 %v3678_v43 }
 0x4a6   :  { %v1277_v22 = vpop.f32.mrb[18].mxu0 }
 0x4a7   :  { %v1278_v23 = vadd.f32 %v2877_v17, %v1277_v22  ;;  %v3341_v24 = vpop.f32.mrb[19].mxu0  ;;  %v1281_v25 = vmax.f32 %v1275_v20, 0.0  ;;  %v3659_v22 = vld [vmem:[%s5154_s4 + $0x820] ss:$8 sps:$4 sm:$0xff]  }
 0x4a8   :  { %1855 = vmatpush1.bf16.msra.mxu0 %v3676_v44 }
 0x4a9   :  { %v1282_v26 = vmax.f32 %v1278_v23, 0.0  ;;  %1856 = vmatprep.subr.bf16.mxu0 %v3681_v45 }
 0x4ab   :  { %v1300_v28 = vpack.c.bf16 %v1282_v26, %v1281_v25  ;;  %v3660_v25 = vld [vmem:[%s5154_s4 + $0x8b0] ss:$8 sps:$4 sm:$0xff]  }
 0x4ac   :  { %1857 = vmatpush1.bf16.msra.mxu0 %v3679_v46  ;;  %v3690_v46 = vld [vmem:[%s5154_s4 + $0x7e4] ss:$8 sps:$4 sm:$0xff]  }
 0x4ad   :  { %1425 = vmatmul.mubr.bf16.vlgmr.msra.gmra.mrb[16].mxu1 %v1300_v28  ;;  %1858 = vmatprep.subr.bf16.mxu0 %v3684_v47  ;;  %v3661_v28 = vld [vmem:[%s5154_s4 + $0x830] ss:$8 sps:$4 sm:$0xff]   ;;  %v3693_v47 = vld [vmem:[%s5154_s4 + $0x7f4] ss:$8 sps:$4 sm:$0xff]  }
 0x4ae   :  { %3343 = vmatpush3.bf16.msra.mxu1 %v3646_v27  ;;  %3358 = vmatprep.mubr.msk.bf16.mxu1 %vm3845_vm0, %v3844_v1 }
 0x4af   :  { %3344 = vmatprep.subr.bf16.mxu1 %v3844_v1 }
 0x4b0   :  { %1859 = vmatpush1.bf16.msra.mxu0 %v3682_v48  ;;  %v3691_v48 = vld [vmem:[%s5154_s4 + $0x7f0] ss:$8 sps:$4 sm:$0xff]  }
 0x4b1   :  { %1860 = vmatprep.subr.bf16.mxu0 %v3687_v49  ;;  %v2924_v49 = vld [vmem:[%s5156_s5 + $0x14] ss:$0 sm:$0xff] }
 0x4b2   :  { %3345 = vmatpush3.bf16.msra.mxu1 %v3647_v29  ;;  %v3662_v29 = vld [vmem:[%s5154_s4 + $0x8c0] ss:$8 sps:$4 sm:$0xff]  }
 0x4b3   :  { %3346 = vmatprep.subr.bf16.mxu1 %v3844_v1 }
 0x4b4   :  { %1861 = vmatpush1.bf16.msra.mxu0 %v3685_v50 }
 0x4b5   :  { %1862 = vmatprep.subr.bf16.mxu0 %v3690_v46 }
 0x4b6   :  { %3347 = vmatpush3.bf16.msra.mxu1 %v3648_v30  ;;  %v3663_v30 = vld [vmem:[%s5154_s4 + $0x840] ss:$8 sps:$4 sm:$0xff]  }
 0x4b7   :  { %3348 = vmatprep.subr.bf16.mxu1 %v3844_v1 }
 0x4ba   :  { %3349 = vmatpush3.bf16.msra.mxu1 %v3649_v31  ;;  %v3664_v31 = vld [vmem:[%s5154_s4 + $0x8d0] ss:$8 sps:$4 sm:$0xff]  }
 0x4bb   :  { %3350 = vmatprep.subr.bf16.mxu1 %v3844_v1 }
 0x4be   :  { %3351 = vmatpush3.bf16.msra.mxu1 %v3650_v34  ;;  %v3665_v34 = vld [vmem:[%s5154_s4 + $0x850] ss:$8 sps:$4 sm:$0xff]  }
 0x4bf   :  { %3352 = vmatprep.subr.bf16.mxu1 %v3844_v1 }
 0x4c2   :  { %3353 = vmatpush3.bf16.msra.mxu1 %v3651_v35 }
 0x4c3   :  { %3354 = vmatprep.subr.bf16.mxu1 %v3844_v1 }
 0x4c6   :  { %3355 = vmatpush3.bf16.msra.mxu1 %v3652_v36  ;;  %v3666_v36 = vld [vmem:[%s5154_s4 + $0x8e0] ss:$8 sps:$4 sm:$0xff]  }
 0x4c7   :  { %3356 = vmatprep.subr.bf16.mxu1 %v3844_v1 }
 0x4ca   :  { %3357 = vmatpush3.bf16.msra.mxu1 %v3653_v37 }
 0x4cb   :  { %3122 = vmatprep.subr.bf16.mxu1 %v3654_v38 }
 0x572   :  { %v3107_v51 = vpop.f32.mrb[20].mxu0 }
 0x573   :  { %v3108_v55 = vpop.f32.mrb[21].mxu0 }
 0x574   :  { %v3109_v56 = vadd.f32 %v3108_v55, %v3107_v51  ;;  %v3110_v57 = vpop.f32.mrb[22].mxu0 }
 0x575   :  { %v3111_v58 = vpop.f32.mrb[23].mxu0 }
 0x576   :  { %v1618_v59 = vadd.f32 %v3109_v56, %v2904_v54  ;;  %v3112_v61 = vadd.f32 %v3111_v58, %v3110_v57 }
 0x578   :  { %v1621_v63 = vadd.f32 %v3112_v61, %v2904_v54  ;;  %v1624_v4 = vmax.f32 %v1618_v59, 0.0  ;;  %v3694_v61 = vld [vmem:[%s5154_s4 + $0x900] ss:$8 sps:$4 sm:$0xff]  }
 0x57a   :  { %v1625_v5 = vmax.f32 %v1621_v63, 0.0 }
 0x57c   :  { %v1643_v8 = vpack.c.bf16 %v1625_v5, %v1624_v4  ;;  %v3695_v4 = vld [vmem:[%s5154_s4 + $0x910] ss:$8 sps:$4 sm:$0xff]   ;;  %v3696_v5 = vld [vmem:[%s5154_s4 + $0x920] ss:$8 sps:$4 sm:$0xff]  }
 0x57e   :  { %3359 = vmatmul.mubr.bf16.vlgmr.msra.gmra.mrb[20].mxu1 %v1643_v8  ;;  %v3699_v8 = vld [vmem:[%s5154_s4 + $0x950] ss:$8 sps:$4 sm:$0xff]  }
 0x57f   :  { %3123 = vmatpush3.bf16.msra.mxu1 %v3655_v7  ;;  %2136 = vmatprep.mubr.bf16.mxu1 %v4476_v16  ;;  %v3698_v7 = vld [vmem:[%s5154_s4 + $0x940] ss:$8 sps:$4 sm:$0xff]  }
 0x580   :  { %v1426_v13 = vpop.f32.mrb[16].mxu1  ;;  %3124 = vmatprep.subr.bf16.mxu1 %v3656_v9  ;;  %v3700_v9 = vld [vmem:[%s5154_s4 + $0x960] ss:$8 sps:$4 sm:$0xff]  }
 0x581   :  { %v4579_v15 = vadd.f32 %v1426_v13, %v1305_v10  ;;  %v1428_v17 = vpop.f32.mrb[17].mxu1 }
 0x582   :  { %v1429_v18 = vadd.f32 %v1428_v17, %v1309_v11  ;;  %v1430_v20 = vpop.f32.mrb[18].mxu1 }
 0x583   :  { %2753 = vst [vmem:[%s5159_s6 + $0x30] sm:$0xff] %v4579_v15  ;;  %v4585_v16 = vadd.f32 %v1430_v20, %v1305_v10  ;;  %v1432_v21 = vpop.f32.mrb[19].mxu1  ;;  %3125 = vmatpush3.bf16.msra.mxu1 %v3657_v12  ;;  %v3702_v20 = vld [vmem:[%s5154_s4 + $0x980] ss:$8 sps:$4 sm:$0xff]  }
 0x584   :  { %v2902_v23 = vmul.f32 -1.442695, %v1429_v18  ;;  %v1433_v24 = vadd.f32 %v1432_v21, %v1309_v11  ;;  %3126 = vmatprep.subr.bf16.mxu1 %v3658_v14  ;;  %v3701_v14 = vld [vmem:[%s5154_s4 + $0x970] ss:$8 sps:$4 sm:$0xff]  }
 0x585   :  { %v2428_v26 = vpack.c.bf16 %v4585_v16, %v4579_v15  ;;  %2754 = vst [vmem:[%s5159_s6 + $0x88] sm:$0xff] %v4585_v16  ;;  %v3703_v21 = vld [vmem:[%s5154_s4 + $0x990] ss:$8 sps:$4 sm:$0xff]   ;;  %v3772_v15 = vld [vmem:[%s5154_s4 + $0x1a4] ss:$8 sps:$4 sm:$0xff]  }
 0x586   :  { %3724 = vpow2.f32 %v2902_v23  ;;  %v2903_v27 = vmul.f32 -1.442695, %v1433_v24  ;;  %v3705_v23 = vld [vmem:[%s5154_s4 + $0x9b0] ss:$8 sps:$4 sm:$0xff]   ;;  %v3706_v24 = vld [vmem:[%s5154_s4 + $0x9c0] ss:$8 sps:$4 sm:$0xff]  }
 0x587   :  { %3127 = vmatpush3.bf16.msra.mxu1 %v3659_v22  ;;  %v3704_v22 = vld [vmem:[%s5154_s4 + $0x9a0] ss:$8 sps:$4 sm:$0xff]  }
 0x588   :  { %3726 = vpow2.f32 %v2903_v27  ;;  %3128 = vmatprep.subr.bf16.mxu1 %v3660_v25  ;;  %v3707_v25 = vld [vmem:[%s5154_s4 + $0x9d0] ss:$8 sps:$4 sm:$0xff]   ;;  %v3708_v27 = vld [vmem:[%s5154_s4 + $0x9e0] ss:$8 sps:$4 sm:$0xff]  }
 0x589   :  { %v3773_v16 = vld [vmem:[%s5154_s4 + $0x1a0] ss:$8 sps:$4 sm:$0xff]  }
 0x58b   :  { %3129 = vmatpush3.bf16.msra.mxu1 %v3661_v28  ;;  %v3709_v28 = vld [vmem:[%s5154_s4 + $0x9f0] ss:$8 sps:$4 sm:$0xff]  }
 0x58c   :  { %3130 = vmatprep.subr.bf16.mxu1 %v3662_v29  ;;  %v3752_v29 = vld [vmem:[%s5154_s4 + $0x80] ss:$8 sps:$4 sm:$0xff]  }
 0x58f   :  { %3131 = vmatpush3.bf16.msra.mxu1 %v3663_v30  ;;  %v3710_v30 = vld [vmem:[%s5154_s4 + $0xa00] ss:$8 sps:$4 sm:$0xff]  }
 0x590   :  { %v3725_v35 = vpop.eup %3724  ;;  %3132 = vmatprep.subr.bf16.mxu1 %v3664_v31  ;;  %v3711_v31 = vld [vmem:[%s5154_s4 + $0xa10] ss:$8 sps:$4 sm:$0xff]  }
 0x591   :  { %v1441_v37 = vadd.f32 1.0, %v3725_v35  ;;  %v3713_v35 = vld [vmem:[%s5154_s4 + $0xa30] ss:$8 sps:$4 sm:$0xff]  }
 0x592   :  { %v3727_v38 = vpop.eup %3726 }
 0x593   :  { %3728 = vrcp.f32 %v1441_v37  ;;  %v1442_v39 = vadd.f32 1.0, %v3727_v38  ;;  %3133 = vmatpush3.bf16.msra.mxu1 %v3665_v34  ;;  %v3712_v34 = vld [vmem:[%s5154_s4 + $0xa20] ss:$8 sps:$4 sm:$0xff]   ;;  %v3715_v37 = vld [vmem:[%s5154_s4 + $0xa50] ss:$8 sps:$4 sm:$0xff]  }
 0x594   :  { %3134 = vmatprep.subr.bf16.mxu1 %v3666_v36  ;;  %v3714_v36 = vld [vmem:[%s5154_s4 + $0xa40] ss:$8 sps:$4 sm:$0xff]   ;;  %v1757_v38 = vld [vmem:[%s5156_s5 + $0x16] sm:$0x3] }
 0x595   :  { %3730 = vrcp.f32 %v1442_v39  ;;  %v1763_v39 = vrot.slane %v1757_v38, %v4209_v62 }
 0x597   :  { %3135 = vmatpush3.bf16.msra.mxu1 %v3667_v40  ;;  %v1767_v40 = vrot.slane %v1757_v38, %v4214_v0  ;;  %v3776_v38 = vld [vmem:[%s5154_s4 + $0x1c4] ss:$8 sps:$4 sm:$0xff]  }
 0x598   :  { %3136 = vmatprep.subr.bf16.mxu1 %v3668_v41 }
 0x59b   :  { %3137 = vmatpush3.bf16.msra.mxu1 %v3669_v42 }
 0x59c   :  { %3382 = vmatprep.subr.bf16.mxu1 %v3844_v1 }
 0x59d   :  { %v4627_v43 = vpop.eup %3728 }
 0x59e   :  { %2755 = vst [vmem:[%s5159_s6 + $0x38] sm:$0xff] %v4627_v43  ;;  %2137 = vmatmul.mubr.bf16.vlgmr.msra.gmra.mrb[24].mxu1 %v4242_v19  ;;  %v3688_v19 = vld [vmem:[%s5154_s4 + $0x7e0] ss:$8 sps:$4 sm:$0xff]  }
 0x59f   :  { %v4634_v44 = vpop.eup %3730  ;;  %3398 = vmatprep.mubr.msk.bf16.mxu1 %vm3845_vm0, %v3844_v1  ;;  %1863 = vmatpush1.bf16.msra.mxu0 %v3688_v19 }
 0x5a0   :  { %2756 = vst [vmem:[%s5159_s6 + $0x90] sm:$0xff] %v4634_v44  ;;  %v2429_v45 = vpack.c.bf16 %v4634_v44, %v4627_v43  ;;  %1864 = vmatprep.subr.bf16.mxu0 %v3693_v47  ;;  %3383 = vmatpush3.bf16.msra.mxu1 %v3702_v20  ;;  %v3755_v20 = vld [vmem:[%s5154_s4 + $0x10] ss:$8 sps:$4 sm:$0xff]   ;;  %v3757_v43 = vld [vmem:[%s5154_s4 + $0x20] ss:$8 sps:$4 sm:$0xff]  }
 0x5a1   :  { %3384 = vmatprep.subr.bf16.mxu1 %v3844_v1  ;;  %v3758_v44 = vld [vmem:[%s5154_s4 + $0xb0] ss:$8 sps:$4 sm:$0xff]  }
 0x5a3   :  { %1865 = vmatpush1.bf16.msra.mxu0 %v3691_v48 }
 0x5a4   :  { %3362 = vmatprep.subr.bf16.mxu0 %v3844_v1  ;;  %3385 = vmatpush3.bf16.msra.mxu1 %v3703_v21  ;;  %v3756_v21 = vld [vmem:[%s5154_s4 + $0xa0] ss:$8 sps:$4 sm:$0xff]  }
 0x5a5   :  { %3386 = vmatprep.subr.bf16.mxu1 %v3844_v1 }
 0x5a8   :  { %3387 = vmatpush3.bf16.msra.mxu1 %v3704_v22  ;;  %v3760_v22 = vld [vmem:[%s5154_s4 + $0xc0] ss:$8 sps:$4 sm:$0xff]  }
 0x5a9   :  { %3388 = vmatprep.subr.bf16.mxu1 %v3844_v1 }
 0x5ac   :  { %3389 = vmatpush3.bf16.msra.mxu1 %v3705_v23  ;;  %v3761_v23 = vld [vmem:[%s5154_s4 + $0x40] ss:$8 sps:$4 sm:$0xff]  }
 0x5ad   :  { %3390 = vmatprep.subr.bf16.mxu1 %v3844_v1 }
 0x5b0   :  { %3391 = vmatpush3.bf16.msra.mxu1 %v3706_v24  ;;  %v3762_v24 = vld [vmem:[%s5154_s4 + $0xd0] ss:$8 sps:$4 sm:$0xff]  }
 0x5b1   :  { %3392 = vmatprep.subr.bf16.mxu1 %v3844_v1 }
 0x5b4   :  { %3393 = vmatpush3.bf16.msra.mxu1 %v3707_v25  ;;  %v3763_v25 = vld [vmem:[%s5154_s4 + $0x50] ss:$8 sps:$4 sm:$0xff]  }
 0x5b5   :  { %3394 = vmatprep.subr.bf16.mxu1 %v3844_v1 }
 0x5b8   :  { %3395 = vmatpush3.bf16.msra.mxu1 %v3708_v27  ;;  %v3764_v27 = vld [vmem:[%s5154_s4 + $0xe0] ss:$8 sps:$4 sm:$0xff]  }
 0x5b9   :  { %3396 = vmatprep.subr.bf16.mxu1 %v3844_v1 }
 0x5bc   :  { %3397 = vmatpush3.bf16.msra.mxu1 %v3709_v28  ;;  %v3765_v28 = vld [vmem:[%s5154_s4 + $0x60] ss:$8 sps:$4 sm:$0xff]  }
 0x5bd   :  { %3171 = vmatprep.subr.bf16.mxu1 %v3752_v29  ;;  %v3766_v29 = vld [vmem:[%s5154_s4 + $0xf0] ss:$8 sps:$4 sm:$0xff]  }
 0x651   :  { %v1732_v50 = vpop.f32.mrb[20].mxu1 }
 0x652   :  { %v1733_v51 = vadd.f32 %v2924_v49, %v1732_v50  ;;  %v3360_v54 = vpop.f32.mrb[21].mxu1 }
 0x653   :  { %v1735_v55 = vpop.f32.mrb[22].mxu1 }
 0x654   :  { %v1736_v56 = vadd.f32 %v2924_v49, %v1735_v55  ;;  %v3361_v57 = vpop.f32.mrb[23].mxu1  ;;  %v1739_v58 = vmax.f32 %v1733_v51, 0.0 }
 0x656   :  { %v1740_v59 = vmax.f32 %v1736_v56, 0.0 }
 0x658   :  { %v1758_v63 = vpack.c.bf16 %v1740_v59, %v1739_v58  ;;  %v2951_v58 = vld [vmem:[%s5156_s5 + $0x18] ss:$0 sm:$0xff] }
 0x65a   :  { %1883 = vmatmul.mubr.bf16.vlgmr.msra.gmra.mrb[24].mxu0 %v1758_v63 }
 0x65b   :  { %3363 = vmatpush3.bf16.msra.mxu0 %v3694_v61  ;;  %3378 = vmatprep.mubr.msk.bf16.mxu0 %vm3845_vm0, %v3844_v1 }
 0x65c   :  { %3364 = vmatprep.subr.bf16.mxu0 %v3844_v1 }
 0x65f   :  { %3365 = vmatpush3.bf16.msra.mxu0 %v3695_v4 }
 0x660   :  { %3366 = vmatprep.subr.bf16.mxu0 %v3844_v1 }
 0x663   :  { %3367 = vmatpush3.bf16.msra.mxu0 %v3696_v5 }
 0x664   :  { %3368 = vmatprep.subr.bf16.mxu0 %v3844_v1 }
 0x667   :  { %3369 = vmatpush3.bf16.msra.mxu0 %v3697_v6 }
 0x668   :  { %3370 = vmatprep.subr.bf16.mxu0 %v3844_v1 }
 0x66b   :  { %3371 = vmatpush3.bf16.msra.mxu0 %v3698_v7 }
 0x66c   :  { %3372 = vmatprep.subr.bf16.mxu0 %v3844_v1 }
 0x66f   :  { %3373 = vmatpush3.bf16.msra.mxu0 %v3699_v8 }
 0x670   :  { %3374 = vmatprep.subr.bf16.mxu0 %v3844_v1 }
 0x671   :  { %v3138_v10 = vpop.f32.mrb[24].mxu1 }
 0x672   :  { %v3139_v11 = vpop.f32.mrb[25].mxu1 }
 0x673   :  { %v4689_v12 = vadd.f32 %v3139_v11, %v3138_v10  ;;  %v3141_v13 = vpop.f32.mrb[26].mxu1  ;;  %3375 = vmatpush3.bf16.msra.mxu0 %v3700_v9 }
 0x674   :  { %v3142_v17 = vpop.f32.mrb[27].mxu1  ;;  %3376 = vmatprep.subr.bf16.mxu0 %v3844_v1 }
 0x675   :  { %v4695_v18 = vadd.f32 %v3142_v17, %v3141_v13  ;;  %v2139_v63 = vadd.f32 %v4689_v12, %v2951_v58  ;;  %v3753_v12 = vld [vmem:[%s5154_s4] ss:$8 sps:$4 sm:$0xff]  }
 0x677   :  { %3377 = vmatpush3.bf16.msra.mxu0 %v3701_v14  ;;  %v2142_v8 = vadd.f32 %v4695_v18, %v2951_v58  ;;  %v3754_v18 = vld [vmem:[%s5154_s4 + $0x90] ss:$8 sps:$4 sm:$0xff]  }
 0x678   :  { %3402 = vmatprep.subr.bf16.mxu0 %v3844_v1 }
 0x67a   :  { %3379 = vmatmul.mubr.msk.bf16.vlgmr.msra.gmra.mrb[28].mxu0 %vm4128_vm3, %v4126_v32 }
 0x67b   :  { %3418 = vmatprep.mubr.msk.bf16.mxu0 %vm3845_vm0, %v3844_v1  ;;  %3403 = vmatpush3.bf16.msra.mxu0 %v3710_v30  ;;  %v3767_v30 = vld [vmem:[%s5154_s4 + $0x70] ss:$8 sps:$4 sm:$0xff]  }
 0x67c   :  { %3404 = vmatprep.subr.bf16.mxu0 %v3844_v1 }
 0x67f   :  { %3405 = vmatpush3.bf16.msra.mxu0 %v3711_v31  ;;  %v3768_v31 = vld [vmem:[%s5154_s4 + $0x184] ss:$8 sps:$4 sm:$0xff]  }
 0x680   :  { %3406 = vmatprep.subr.bf16.mxu0 %v3844_v1 }
 0x683   :  { %3407 = vmatpush3.bf16.msra.mxu0 %v3712_v34  ;;  %v3769_v34 = vld [vmem:[%s5154_s4 + $0x180] ss:$8 sps:$4 sm:$0xff]  }
 0x684   :  { %3408 = vmatprep.subr.bf16.mxu0 %v3844_v1 }
 0x687   :  { %3409 = vmatpush3.bf16.msra.mxu0 %v3713_v35  ;;  %v3770_v35 = vld [vmem:[%s5154_s4 + $0x194] ss:$8 sps:$4 sm:$0xff]  }
 0x688   :  { %3410 = vmatprep.subr.bf16.mxu0 %v3844_v1 }
 0x68b   :  { %3411 = vmatpush3.bf16.msra.mxu0 %v3714_v36  ;;  %v3771_v36 = vld [vmem:[%s5154_s4 + $0x190] ss:$8 sps:$4 sm:$0xff]  }
 0x68c   :  { %3412 = vmatprep.subr.bf16.mxu0 %v3844_v1 }
 0x68f   :  { %3413 = vmatpush3.bf16.msra.mxu0 %v3715_v37  ;;  %v3775_v37 = vld [vmem:[%s5154_s4 + $0x1b0] ss:$8 sps:$4 sm:$0xff]  }
 0x690   :  { %3414 = vmatprep.subr.bf16.mxu0 %v3844_v1 }
 0x72d   :  { %v1884_v41 = vpop.f32.mrb[24].mxu0 }
 0x72e   :  { %v4766_v42 = vadd.f32 %v1884_v41, %v1763_v39  ;;  %v1886_v46 = vpop.f32.mrb[25].mxu0  ;;  %v3779_v41 = vld [vmem:[%s5154_s4 + $0x1d0] ss:$8 sps:$4 sm:$0xff]  }
 0x72f   :  { %v1887_v19 = vadd.f32 %v1886_v46, %v1767_v40  ;;  %v1888_v47 = vpop.f32.mrb[26].mxu0  ;;  %v3780_v46 = vld [vmem:[%s5154_s4 + $0x1e4] ss:$8 sps:$4 sm:$0xff]  }
 0x730   :  { %2757 = vst [vmem:[%s5159_s6 + $0x40] sm:$0xff] %v4766_v42  ;;  %v4772_v48 = vadd.f32 %v1888_v47, %v1763_v39  ;;  %v1890_v49 = vpop.f32.mrb[27].mxu0  ;;  %v3777_v39 = vld [vmem:[%s5154_s4 + $0x1c0] ss:$8 sps:$4 sm:$0xff]   ;;  %v3782_v47 = vld [vmem:[%s5154_s4 + $0x1f4] ss:$8 sps:$4 sm:$0xff]  }
 0x731   :  { %v2949_v50 = vmul.f32 -1.442695, %v1887_v19  ;;  %v1891_v51 = vadd.f32 %v1890_v49, %v1767_v40  ;;  %v3778_v40 = vld [vmem:[%s5154_s4 + $0x1d4] ss:$8 sps:$4 sm:$0xff]   ;;  %v3781_v19 = vld [vmem:[%s5154_s4 + $0x1e0] ss:$8 sps:$4 sm:$0xff]  }
 0x732   :  { %v2564_v62 = vpack.c.bf16 %v4772_v48, %v4766_v42  ;;  %2758 = vst [vmem:[%s5159_s6 + $0x98] sm:$0xff] %v4772_v48  ;;  %v3783_v49 = vld [vmem:[%s5154_s4 + $0x1f0] ss:$8 sps:$4 sm:$0xff]   ;;  %v3811_v42 = vld [vmem:[%s5154_s4 + $0x3a0] ss:$8 sps:$4 sm:$0xff]  }
 0x733   :  { %3732 = vpow2.f32 %v2949_v50  ;;  %v2950_v0 = vmul.f32 -1.442695, %v1891_v51  ;;  %v3716_v50 = vld [vmem:[%s5154_s4 + $0xa60] ss:$8 sps:$4 sm:$0xff]   ;;  %v3717_v51 = vld [vmem:[%s5154_s4 + $0xa70] ss:$8 sps:$4 sm:$0xff]  }
 0x734   :  { %3415 = vmatpush3.bf16.msra.mxu0 %v3716_v50  ;;  %v3812_v48 = vld [vmem:[%s5154_s4 + $0x3b0] ss:$8 sps:$4 sm:$0xff]   ;;  %v2988_v50 = vld [vmem:[%s5156_s5 + $0x1c] ss:$0 sm:$0xff] }
 0x735   :  { %3734 = vpow2.f32 %v2950_v0  ;;  %3416 = vmatprep.subr.bf16.mxu0 %v3844_v1  ;;  %v2979_v0 = vld [vmem:[%s5156_s5 + $0x1a] ss:$0 sm:$0xff] }
 0x738   :  { %3417 = vmatpush3.bf16.msra.mxu0 %v3717_v51 }
 0x739   :  { %3422 = vmatprep.subr.bf16.mxu0 %v3844_v1 }
 0x73d   :  { %v3733_v54 = vpop.eup %3732 }
 0x73e   :  { %v1899_v55 = vadd.f32 1.0, %v3733_v54 }
 0x73f   :  { %v3735_v56 = vpop.eup %3734 }
 0x740   :  { %3736 = vrcp.f32 %v1899_v55  ;;  %v1900_v57 = vadd.f32 1.0, %v3735_v56 }
 0x742   :  { %3738 = vrcp.f32 %v1900_v57 }
 0x74a   :  { %v4783_v59 = vpop.eup %3736 }
 0x74b   :  { %2759 = vst [vmem:[%s5159_s6 + $0x48] sm:$0xff] %v4783_v59 }
 0x74c   :  { %v4789_v61 = vpop.eup %3738 }
 0x74d   :  { %2760 = vst [vmem:[%s5159_s6 + $0xa0] sm:$0xff] %v4789_v61  ;;  %v2179_v4 = vpop.f32.mrb[28].mxu0  ;;  %v2565_v5 = vpack.c.bf16 %v4789_v61, %v4783_v59  ;;  %v3798_v59 = vld [vmem:[%s5154_s4 + $0x220] ss:$8 sps:$4 sm:$0xff]   ;;  %v3799_v61 = vld [vmem:[%s5154_s4 + $0x2b0] ss:$8 sps:$4 sm:$0xff]  }
 0x74e   :  { %v2180_v6 = vadd.f32 %v2179_v4, %v2139_v63  ;;  %v3380_v7 = vpop.f32.mrb[29].mxu0 }
 0x74f   :  { %v2182_v9 = vpop.f32.mrb[30].mxu0 }
 0x750   :  { %v2183_v10 = vadd.f32 %v2182_v9, %v2142_v8  ;;  %v3381_v11 = vpop.f32.mrb[31].mxu0  ;;  %v2186_v13 = vmax.f32 %v2180_v6, 0.0  ;;  %v3784_v8 = vld [vmem:[%s5154_s4 + $0x100] ss:$8 sps:$4 sm:$0xff]   ;;  %v3785_v9 = vld [vmem:[%s5154_s4 + $0x110] ss:$8 sps:$4 sm:$0xff]  }
 0x751   :  { %v3787_v11 = vld [vmem:[%s5154_s4 + $0x130] ss:$8 sps:$4 sm:$0xff]  }
 0x752   :  { %v2187_v14 = vmax.f32 %v2183_v10, 0.0  ;;  %v3786_v10 = vld [vmem:[%s5154_s4 + $0x120] ss:$8 sps:$4 sm:$0xff]  }
 0x754   :  { %v2205_v17 = vpack.c.bf16 %v2187_v14, %v2186_v13  ;;  %v3788_v13 = vld [vmem:[%s5154_s4 + $0x140] ss:$8 sps:$4 sm:$0xff]   ;;  %v3789_v14 = vld [vmem:[%s5154_s4 + $0x150] ss:$8 sps:$4 sm:$0xff]  }
 0x756   :  { %3399 = vmatmul.mubr.bf16.vlgmr.msra.gmra.mrb[28].mxu1 %v2205_v17 }
 0x757   :  { %3172 = vmatpush3.bf16.msra.mxu1 %v3753_v12  ;;  %2462 = vmatprep.mubr.bf16.mxu1 %v2429_v45  ;;  %v3759_v45 = vld [vmem:[%s5154_s4 + $0x30] ss:$8 sps:$4 sm:$0xff]  }
 0x758   :  { %3173 = vmatprep.subr.bf16.mxu1 %v3754_v18 }
 0x75b   :  { %3174 = vmatpush3.bf16.msra.mxu1 %v3755_v20 }
 0x75c   :  { %3175 = vmatprep.subr.bf16.mxu1 %v3756_v21  ;;  %v3790_v21 = vld [vmem:[%s5154_s4 + $0x160] ss:$8 sps:$4 sm:$0xff]  }
 0x75f   :  { %3176 = vmatpush3.bf16.msra.mxu1 %v3757_v43 }
 0x760   :  { %3177 = vmatprep.subr.bf16.mxu1 %v3758_v44  ;;  %v3791_v44 = vld [vmem:[%s5156_s5] ss:$0 sm:$0xff] }
 0x763   :  { %3178 = vmatpush3.bf16.msra.mxu1 %v3759_v45 }
 0x764   :  { %3179 = vmatprep.subr.bf16.mxu1 %v3760_v22 }
 0x767   :  { %3180 = vmatpush3.bf16.msra.mxu1 %v3761_v23 }
 0x768   :  { %3181 = vmatprep.subr.bf16.mxu1 %v3762_v24  ;;  %v3792_v24 = vld [vmem:[%s5154_s4 + $0x170] ss:$8 sps:$4 sm:$0xff]  }
 0x76b   :  { %3182 = vmatpush3.bf16.msra.mxu1 %v3763_v25  ;;  %v3793_v25 = vld [vmem:[%s5154_s4 + $0x280] ss:$8 sps:$4 sm:$0xff]  }
 0x76c   :  { %3183 = vmatprep.subr.bf16.mxu1 %v3764_v27 }
 0x76f   :  { %3184 = vmatpush3.bf16.msra.mxu1 %v3765_v28 }
 0x770   :  { %3185 = vmatprep.subr.bf16.mxu1 %v3766_v29 }
 0x773   :  { %3186 = vmatpush3.bf16.msra.mxu1 %v3767_v30  ;;  %v3794_v30 = vld [vmem:[%s5154_s4 + $0x200] ss:$8 sps:$4 sm:$0xff]  }
 0x774   :  { %2518 = vmatprep.subr.bf16.mxu1 %v3768_v31  ;;  %v3795_v31 = vld [vmem:[%s5154_s4 + $0x290] ss:$8 sps:$4 sm:$0xff]  }
 0x776   :  { %2463 = vmatmul.mubr.bf16.vlgmr.msra.gmra.mrb[32].mxu1 %v2428_v26  ;;  %v3774_v26 = vld [vmem:[%s5154_s4 + $0x1b4] ss:$8 sps:$4 sm:$0xff]  }
 0x777   :  { %2519 = vmatpush1.bf16.msra.mxu1 %v3769_v34  ;;  %2550 = vmatprep.mubr.bf16.mxu1 %v3846_v60  ;;  %v3796_v34 = vld [vmem:[%s5154_s4 + $0x210] ss:$8 sps:$4 sm:$0xff]  }
 0x778   :  { %2520 = vmatprep.subr.bf16.mxu1 %v3770_v35  ;;  %v3797_v35 = vld [vmem:[%s5154_s4 + $0x2a0] ss:$8 sps:$4 sm:$0xff]  }
 0x77b   :  { %2521 = vmatpush1.bf16.msra.mxu1 %v3771_v36  ;;  %v3801_v36 = vld [vmem:[%s5154_s4 + $0x2c0] ss:$8 sps:$4 sm:$0xff]  }
 0x77c   :  { %2522 = vmatprep.subr.bf16.mxu1 %v3772_v15  ;;  %v3802_v15 = vld [vmem:[%s5154_s4 + $0x240] ss:$8 sps:$4 sm:$0xff]  }
 0x77f   :  { %2523 = vmatpush1.bf16.msra.mxu1 %v3773_v16  ;;  %v3803_v16 = vld [vmem:[%s5154_s4 + $0x2d0] ss:$8 sps:$4 sm:$0xff]  }
 0x780   :  { %2524 = vmatprep.subr.bf16.mxu1 %v3774_v26  ;;  %v3804_v26 = vld [vmem:[%s5154_s4 + $0x250] ss:$8 sps:$4 sm:$0xff]  }
 0x783   :  { %2525 = vmatpush1.bf16.msra.mxu1 %v3775_v37  ;;  %v3805_v37 = vld [vmem:[%s5154_s4 + $0x2e0] ss:$8 sps:$4 sm:$0xff]  }
 0x784   :  { %2526 = vmatprep.subr.bf16.mxu1 %v3776_v38  ;;  %v3806_v38 = vld [vmem:[%s5154_s4 + $0x260] ss:$8 sps:$4 sm:$0xff]  }
 0x787   :  { %2527 = vmatpush1.bf16.msra.mxu1 %v3777_v39  ;;  %v3807_v39 = vld [vmem:[%s5154_s4 + $0x2f0] ss:$8 sps:$4 sm:$0xff]  }
 0x788   :  { %2528 = vmatprep.subr.bf16.mxu1 %v3778_v40  ;;  %v3808_v40 = vld [vmem:[%s5154_s4 + $0x270] ss:$8 sps:$4 sm:$0xff]  }
 0x78b   :  { %2529 = vmatpush1.bf16.msra.mxu1 %v3779_v41  ;;  %v3809_v41 = vld [vmem:[%s5154_s4 + $0x380] ss:$8 sps:$4 sm:$0xff]  }
 0x78c   :  { %2530 = vmatprep.subr.bf16.mxu1 %v3780_v46  ;;  %v3810_v46 = vld [vmem:[%s5154_s4 + $0x390] ss:$8 sps:$4 sm:$0xff]  }
 0x78f   :  { %2531 = vmatpush1.bf16.msra.mxu1 %v3781_v19  ;;  %v3814_v19 = vld [vmem:[%s5154_s4 + $0x3d0] ss:$8 sps:$4 sm:$0xff]  }
 0x790   :  { %2532 = vmatprep.subr.bf16.mxu1 %v3782_v47  ;;  %v3815_v47 = vld [vmem:[%s5154_s4 + $0x3e0] ss:$8 sps:$4 sm:$0xff]  }
 0x793   :  { %2533 = vmatpush1.bf16.msra.mxu1 %v3783_v49  ;;  %v3816_v49 = vld [vmem:[%s5154_s4 + $0x3f0] ss:$8 sps:$4 sm:$0xff]  }
 0x794   :  { %3442 = vmatprep.subr.bf16.mxu1 %v3844_v1 }
 0x829   :  { %v2294_v54 = vpop.f32.mrb[28].mxu1 }
 0x82a   :  { %v2295_v55 = vadd.f32 %v2979_v0, %v2294_v54  ;;  %v3400_v56 = vpop.f32.mrb[29].mxu1 }
 0x82b   :  { %v2297_v57 = vpop.f32.mrb[30].mxu1 }
 0x82c   :  { %v2298_v58 = vadd.f32 %v2979_v0, %v2297_v57  ;;  %v3401_v63 = vpop.f32.mrb[31].mxu1  ;;  %v2301_v4 = vmax.f32 %v2295_v55, 0.0 }
 0x82e   :  { %v2302_v6 = vmax.f32 %v2298_v58, 0.0 }
 0x830   :  { %v2320_v7 = vpack.c.bf16 %v2302_v6, %v2301_v4 }
 0x832   :  { %3419 = vmatmul.mubr.bf16.vlgmr.msra.gmra.mrb[32].mxu0 %v2320_v7 }
 0x833   :  { %3423 = vmatpush3.bf16.msra.mxu0 %v3784_v8  ;;  %3438 = vmatprep.mubr.msk.bf16.mxu0 %vm3845_vm0, %v3844_v1 }
 0x834   :  { %3424 = vmatprep.subr.bf16.mxu0 %v3844_v1 }
 0x837   :  { %3425 = vmatpush3.bf16.msra.mxu0 %v3785_v9 }
 0x838   :  { %3426 = vmatprep.subr.bf16.mxu0 %v3844_v1 }
 0x83b   :  { %3427 = vmatpush3.bf16.msra.mxu0 %v3786_v10 }
 0x83c   :  { %3428 = vmatprep.subr.bf16.mxu0 %v3844_v1 }
 0x83f   :  { %3429 = vmatpush3.bf16.msra.mxu0 %v3787_v11 }
 0x840   :  { %3430 = vmatprep.subr.bf16.mxu0 %v3844_v1 }
 0x843   :  { %3431 = vmatpush3.bf16.msra.mxu0 %v3788_v13  ;;  %v3817_v13 = vld [vmem:[%s5156_s5 + $0x2] ss:$0 sm:$0xff] }
 0x844   :  { %3432 = vmatprep.subr.bf16.mxu0 %v3844_v1 }
 0x847   :  { %3433 = vmatpush3.bf16.msra.mxu0 %v3789_v14 }
 0x848   :  { %3434 = vmatprep.subr.bf16.mxu0 %v3844_v1 }
 0x849   :  { %v3187_v17 = vpop.f32.mrb[32].mxu1 }
 0x84a   :  { %v3188_v12 = vpop.f32.mrb[33].mxu1 }
 0x84b   :  { %v3189_v18 = vadd.f32 %v3188_v12, %v3187_v17  ;;  %v3190_v20 = vpop.f32.mrb[34].mxu1  ;;  %3435 = vmatpush3.bf16.msra.mxu0 %v3790_v21 }
 0x84c   :  { %v3191_v43 = vpop.f32.mrb[35].mxu1  ;;  %3436 = vmatprep.subr.bf16.mxu0 %v3844_v1 }
 0x84d   :  { %v2465_v45 = vadd.f32 %v3791_v44, %v3189_v18  ;;  %v3192_v22 = vadd.f32 %v3191_v43, %v3190_v20 }
 0x84f   :  { %v2468_v23 = vadd.f32 %v3791_v44, %v3192_v22  ;;  %3437 = vmatpush3.bf16.msra.mxu0 %v3792_v24  ;;  %v2471_v27 = vmax.f32 %v2465_v45, 0.0  ;;  %v3818_v45 = vld [vmem:[%s5154_s4 + $0x300] ss:$8 sps:$4 sm:$0xff]   ;;  %v3819_v22 = vld [vmem:[%s5154_s4 + $0x310] ss:$8 sps:$4 sm:$0xff]  }
 0x850   :  { %3202 = vmatprep.subr.bf16.mxu0 %v3793_v25  ;;  %v3821_v24 = vld [vmem:[%s5154_s4 + $0x330] ss:$8 sps:$4 sm:$0xff]   ;;  %v3822_v25 = vld [vmem:[%s5154_s4 + $0x340] ss:$8 sps:$4 sm:$0xff]  }
 0x851   :  { %v2472_v28 = vmax.f32 %v2468_v23, 0.0  ;;  %v3820_v23 = vld [vmem:[%s5154_s4 + $0x320] ss:$8 sps:$4 sm:$0xff]  }
 0x853   :  { %v2473_v29 = vpack.c.bf16 %v2472_v28, %v2471_v27  ;;  %v3823_v27 = vld [vmem:[%s5154_s4 + $0x350] ss:$8 sps:$4 sm:$0xff]  }
 0x855   :  { %3439 = vmatmul.mubr.bf16.vlgmr.msra.gmra.mrb[36].mxu0 %v2473_v29 }
 0x856   :  { %3203 = vmatpush3.bf16.msra.mxu0 %v3794_v30  ;;  %2598 = vmatprep.mubr.bf16.mxu0 %v2565_v5  ;;  %v3800_v5 = vld [vmem:[%s5154_s4 + $0x230] ss:$8 sps:$4 sm:$0xff]  }
 0x857   :  { %3204 = vmatprep.subr.bf16.mxu0 %v3795_v31 }
 0x85a   :  { %3205 = vmatpush3.bf16.msra.mxu0 %v3796_v34  ;;  %v3824_v34 = vld [vmem:[%s5154_s4 + $0x360] ss:$8 sps:$4 sm:$0xff]  }
 0x85b   :  { %3206 = vmatprep.subr.bf16.mxu0 %v3797_v35 }
 0x85e   :  { %3207 = vmatpush3.bf16.msra.mxu0 %v3798_v59 }
 0x85f   :  { %3208 = vmatprep.subr.bf16.mxu0 %v3799_v61  ;;  %v3825_v61 = vld [vmem:[%s5154_s4 + $0x370] ss:$8 sps:$4 sm:$0xff]  }
 0x862   :  { %3209 = vmatpush3.bf16.msra.mxu0 %v3800_v5  ;;  %v3826_v5 = vld [vmem:[%s5154_s4 + $0x404] ss:$8 sps:$4 sm:$0xff]  }
 0x863   :  { %3210 = vmatprep.subr.bf16.mxu0 %v3801_v36  ;;  %v3827_v36 = vld [vmem:[%s5154_s4 + $0x400] ss:$8 sps:$4 sm:$0xff]  }
 0x866   :  { %3211 = vmatpush3.bf16.msra.mxu0 %v3802_v15  ;;  %v3829_v15 = vld [vmem:[%s5154_s4 + $0x410] ss:$8 sps:$4 sm:$0xff]  }
 0x867   :  { %3212 = vmatprep.subr.bf16.mxu0 %v3803_v16  ;;  %v3833_v16 = vld [vmem:[%s5154_s4 + $0x430] ss:$8 sps:$4 sm:$0xff]  }
 0x86a   :  { %3213 = vmatpush3.bf16.msra.mxu0 %v3804_v26  ;;  %v3834_v26 = vld [vmem:[%s5154_s4 + $0x444] ss:$8 sps:$4 sm:$0xff]  }
 0x86b   :  { %3214 = vmatprep.subr.bf16.mxu0 %v3805_v37  ;;  %v3835_v37 = vld [vmem:[%s5154_s4 + $0x440] ss:$8 sps:$4 sm:$0xff]  }
 0x86e   :  { %3215 = vmatpush3.bf16.msra.mxu0 %v3806_v38  ;;  %v3836_v38 = vld [vmem:[%s5154_s4 + $0x454] ss:$8 sps:$4 sm:$0xff]  }
 0x86f   :  { %3216 = vmatprep.subr.bf16.mxu0 %v3807_v39  ;;  %v3837_v39 = vld [vmem:[%s5154_s4 + $0x450] ss:$8 sps:$4 sm:$0xff]  }
 0x872   :  { %3217 = vmatpush3.bf16.msra.mxu0 %v3808_v40  ;;  %v3838_v40 = vld [vmem:[%s5154_s4 + $0x464] ss:$8 sps:$4 sm:$0xff]  }
 0x873   :  { %3462 = vmatprep.subr.bf16.mxu0 %v3844_v1 }
 0x875   :  { %2599 = vmatmul.mubr.bf16.vlgmr.msra.gmra.mrb[40].mxu0 %v2564_v62  ;;  %v3813_v62 = vld [vmem:[%s5154_s4 + $0x3c0] ss:$8 sps:$4 sm:$0xff]  }
 0x876   :  { %3463 = vmatpush3.bf16.msra.mxu0 %v3809_v41  ;;  %3478 = vmatprep.mubr.msk.bf16.mxu0 %vm3845_vm0, %v3844_v1  ;;  %v3839_v41 = vld [vmem:[%s5154_s4 + $0x460] ss:$8 sps:$4 sm:$0xff]  }
 0x877   :  { %3464 = vmatprep.subr.bf16.mxu0 %v3844_v1 }
 0x87a   :  { %3465 = vmatpush3.bf16.msra.mxu0 %v3810_v46  ;;  %v3840_v46 = vld [vmem:[%s5154_s4 + $0x474] ss:$8 sps:$4 sm:$0xff]  }
 0x87b   :  { %3466 = vmatprep.subr.bf16.mxu0 %v3844_v1 }
 0x87e   :  { %3467 = vmatpush3.bf16.msra.mxu0 %v3811_v42  ;;  %v3841_v42 = vld [vmem:[%s5154_s4 + $0x470] ss:$8 sps:$4 sm:$0xff]  }
 0x87f   :  { %3468 = vmatprep.subr.bf16.mxu0 %v3844_v1 }
 0x882   :  { %3469 = vmatpush3.bf16.msra.mxu0 %v3812_v48 }
 0x883   :  { %3470 = vmatprep.subr.bf16.mxu0 %v3844_v1 }
 0x886   :  { %3471 = vmatpush3.bf16.msra.mxu0 %v3813_v62 }
 0x887   :  { %3472 = vmatprep.subr.bf16.mxu0 %v3844_v1 }
 0x88a   :  { %3473 = vmatpush3.bf16.msra.mxu0 %v3814_v19 }
 0x88b   :  { %3474 = vmatprep.subr.bf16.mxu0 %v3844_v1 }
 0x88e   :  { %3475 = vmatpush3.bf16.msra.mxu0 %v3815_v47 }
 0x88f   :  { %3476 = vmatprep.subr.bf16.mxu0 %v3844_v1 }
 0x892   :  { %3477 = vmatpush3.bf16.msra.mxu0 %v3816_v49 }
 0x905   :  { %v2409_v51 = vpop.f32.mrb[32].mxu0 }
 0x906   :  { %v2410_v0 = vadd.f32 %v2988_v50, %v2409_v51  ;;  %v3420_v54 = vpop.f32.mrb[33].mxu0 }
 0x907   :  { %v2412_v55 = vpop.f32.mrb[34].mxu0 }
 0x908   :  { %v2997_v56 = vmul.f32 -1.442695, %v2410_v0  ;;  %v2413_v57 = vadd.f32 %v2988_v50, %v2412_v55  ;;  %v3421_v58 = vpop.f32.mrb[35].mxu0  ;;  %v33_v0 = vld [vmem:[%s5160_s3 + $0x10] sm:$0xff] }
 0x90a   :  { %3740 = vpow2.f32 %v2997_v56  ;;  %v2998_v63 = vmul.f32 -1.442695, %v2413_v57 }
 0x90c   :  { %3742 = vpow2.f32 %v2998_v63 }
 0x914   :  { %v3741_v4 = vpop.eup %3740 }
 0x915   :  { %v2422_v6 = vadd.f32 1.0, %v3741_v4 }
 0x916   :  { %v3743_v7 = vpop.eup %3742 }
 0x917   :  { %3744 = vrcp.f32 %v2422_v6  ;;  %v2423_v8 = vadd.f32 1.0, %v3743_v7 }
 0x919   :  { %3746 = vrcp.f32 %v2423_v8 }
 0x921   :  { %v3745_v9 = vpop.eup %3744 }
 0x922   :  { %2761 = vst [vmem:[%s5159_s6 + $0x50] sm:$0xff] %v3745_v9 }
 0x923   :  { %v3747_v10 = vpop.eup %3746 }
 0x924   :  { %2762 = vst [vmem:[%s5159_s6 + $0xa8] sm:$0xff] %v3747_v10 }
 0x928   :  { %v2508_v11 = vpop.f32.mrb[36].mxu0 }
 0x929   :  { %v2509_v14 = vadd.f32 %v3817_v13, %v2508_v11  ;;  %v3440_v17 = vpop.f32.mrb[37].mxu0 }
 0x92a   :  { %v2511_v12 = vpop.f32.mrb[38].mxu0  ;;  %v3843_v17 = vld [vmem:[%s5156_s5 + $0x8] ss:$0 sm:$0xff] }
 0x92b   :  { %v2512_v18 = vadd.f32 %v3817_v13, %v2511_v12  ;;  %v3441_v20 = vpop.f32.mrb[39].mxu0  ;;  %v2515_v21 = vmax.f32 %v2509_v14, 0.0 }
 0x92d   :  { %v2516_v43 = vmax.f32 %v2512_v18, 0.0 }
 0x92f   :  { %v2517_v44 = vpack.c.bf16 %v2516_v43, %v2515_v21 }
 0x931   :  { %2551 = vmatmul.mubr.bf16.vlgmr.msra.gmra.mrb[36].mxu1 %v2517_v44 }
 0x932   :  { %3443 = vmatpush3.bf16.msra.mxu1 %v3818_v45  ;;  %3458 = vmatprep.mubr.msk.bf16.mxu1 %vm3845_vm0, %v3844_v1 }
 0x933   :  { %3444 = vmatprep.subr.bf16.mxu1 %v3844_v1 }
 0x936   :  { %3445 = vmatpush3.bf16.msra.mxu1 %v3819_v22 }
 0x937   :  { %3446 = vmatprep.subr.bf16.mxu1 %v3844_v1 }
 0x93a   :  { %3447 = vmatpush3.bf16.msra.mxu1 %v3820_v23 }
 0x93b   :  { %3448 = vmatprep.subr.bf16.mxu1 %v3844_v1 }
 0x93e   :  { %3449 = vmatpush3.bf16.msra.mxu1 %v3821_v24 }
 0x93f   :  { %3450 = vmatprep.subr.bf16.mxu1 %v3844_v1 }
 0x942   :  { %3451 = vmatpush3.bf16.msra.mxu1 %v3822_v25 }
 0x943   :  { %3452 = vmatprep.subr.bf16.mxu1 %v3844_v1 }
 0x946   :  { %3453 = vmatpush3.bf16.msra.mxu1 %v3823_v27 }
 0x947   :  { %3454 = vmatprep.subr.bf16.mxu1 %v3844_v1 }
 0x948   :  { %v3218_v28 = vpop.f32.mrb[40].mxu0 }
 0x949   :  { %v3219_v29 = vpop.f32.mrb[41].mxu0 }
 0x94a   :  { %v3220_v30 = vadd.f32 %v3219_v29, %v3218_v28  ;;  %v3221_v31 = vpop.f32.mrb[42].mxu0  ;;  %3455 = vmatpush3.bf16.msra.mxu1 %v3824_v34 }
 0x94b   :  { %v3222_v35 = vpop.f32.mrb[43].mxu0  ;;  %3456 = vmatprep.subr.bf16.mxu1 %v3844_v1  ;;  %v3828_v1 = vld [vmem:[%s5154_s4 + $0x414] ss:$8 sps:$4 sm:$0xff]  }
 0x94c   :  { %v3223_v59 = vadd.f32 %v3222_v35, %v3221_v31  ;;  %v36_v31 = vld [vmem:[%s5160_s3 + $0x28] sm:$0xff] }
 0x94e   :  { %3457 = vmatpush3.bf16.msra.mxu1 %v3825_v61 }
 0x94f   :  { %2695 = vmatprep.subr.bf16.mxu1 %v3826_v5 }
 0x951   :  { %3459 = vmatmul.mubr.msk.bf16.vlgmr.msra.gmra.mrb[40].mxu1 %vm4128_vm3, %v4126_v32  ;;  %v3830_v32 = vld [vmem:[%s5154_s4 + $0x424] ss:$8 sps:$4 sm:$0xff]  }
 0x952   :  { %2696 = vmatpush1.bf16.msra.mxu1 %v3827_v36  ;;  %2727 = vmatprep.mubr.bf16.mxu1 %v3846_v60  ;;  %v3832_v60 = vld [vmem:[%s5154_s4 + $0x434] ss:$8 sps:$4 sm:$0xff]  }
 0x953   :  { %2697 = vmatprep.subr.bf16.mxu1 %v3828_v1 }
 0x956   :  { %2698 = vmatpush1.bf16.msra.mxu1 %v3829_v15 }
 0x957   :  { %2699 = vmatprep.subr.bf16.mxu1 %v3830_v32 }
 0x95a   :  { %2700 = vmatpush1.bf16.msra.mxu1 %v3831_v33 }
 0x95b   :  { %2701 = vmatprep.subr.bf16.mxu1 %v3832_v60 }
 0x95e   :  { %2702 = vmatpush1.bf16.msra.mxu1 %v3833_v16 }
 0x95f   :  { %2703 = vmatprep.subr.bf16.mxu1 %v3834_v26 }
 0x962   :  { %2704 = vmatpush1.bf16.msra.mxu1 %v3835_v37 }
 0x963   :  { %2705 = vmatprep.subr.bf16.mxu1 %v3836_v38 }
 0x966   :  { %2706 = vmatpush1.bf16.msra.mxu1 %v3837_v39 }
 0x967   :  { %2707 = vmatprep.subr.bf16.mxu1 %v3838_v40 }
 0x96a   :  { %2708 = vmatpush1.bf16.msra.mxu1 %v3839_v41 }
 0x96b   :  { %2709 = vmatprep.subr.bf16.mxu1 %v3840_v46 }
 0x96e   :  { %2710 = vmatpush1.bf16.msra.mxu1 %v3841_v42 }
 0xa04   :  { %v2552_v48 = vpop.f32.mrb[36].mxu1 }
 0xa05   :  { %v2553_v62 = vpop.f32.mrb[37].mxu1 }
 0xa06   :  { %v2554_v19 = vpop.f32.mrb[38].mxu1 }
 0xa07   :  { %v2556_v47 = vpop.f32.mrb[39].mxu1  ;;  %v2555_v55 = vadd.f32 %v2554_v19, %v4217_v2 }
 0xa08   :  { %v2557_v49 = vadd.f32 %v2556_v47, %v4220_v3  ;;  %v3842_v3 = vld [vmem:[%s5156_s5 + $0x6] ss:$0 sm:$0xff] }
 0xa09   :  { %v2601_v58 = vadd.f32 %v3842_v3, %v3220_v30  ;;  %v2604_v7 = vadd.f32 %v3842_v3, %v3223_v59 }
 0xa0a   :  { %v2559_v50 = vmul.f32 0.5, %v2557_v49 }
 0xa0c   :  { %v2560_v51 = vmul.f32 1.442695, %v2559_v50 }
 0xa0e   :  { %3748 = vpow2.f32 %v2560_v51 }
 0xa18   :  { %v3749_v54 = vpop.eup %3748 }
 0xa19   :  { %v2562_v56 = vmul.f32 %v3749_v54, %v33_v0 }
 0xa1b   :  { %v2563_v57 = vadd.f32 %v2562_v56, %v2555_v55 }
 0xa1d   :  { %2763 = vst [vmem:[%s5161_s7] sm:$0xff] %v2563_v57 }
 0xa24   :  { %v2641_v63 = vpop.f32.mrb[40].mxu1 }
 0xa25   :  { %v2642_v4 = vadd.f32 %v2641_v63, %v2601_v58  ;;  %v3460_v6 = vpop.f32.mrb[41].mxu1 }
 0xa26   :  { %v2644_v8 = vpop.f32.mrb[42].mxu1 }
 0xa27   :  { %v2645_v9 = vadd.f32 %v2644_v8, %v2604_v7  ;;  %v3461_v10 = vpop.f32.mrb[43].mxu1  ;;  %v2648_v11 = vmax.f32 %v2642_v4, 0.0 }
 0xa29   :  { %v2649_v2 = vmax.f32 %v2645_v9, 0.0 }
 0xa2b   :  { %v2650_v13 = vpack.c.bf16 %v2649_v2, %v2648_v11 }
 0xa2d   :  { %3479 = vmatmul.mubr.bf16.vlgmr.msra.gmra.mrb[44].mxu0 %v2650_v13 }
 0xb00   :  { %v2685_v14 = vpop.f32.mrb[44].mxu0 }
 0xb01   :  { %v2686_v12 = vadd.f32 %v3843_v17, %v2685_v14  ;;  %v3480_v18 = vpop.f32.mrb[45].mxu0 }
 0xb02   :  { %v2688_v20 = vpop.f32.mrb[46].mxu0 }
 0xb03   :  { %v2689_v21 = vadd.f32 %v3843_v17, %v2688_v20  ;;  %v3481_v43 = vpop.f32.mrb[47].mxu0  ;;  %v2692_v44 = vmax.f32 %v2686_v12, 0.0 }
 0xb05   :  { %v2693_v45 = vmax.f32 %v2689_v21, 0.0 }
 0xb07   :  { %v2694_v22 = vpack.c.bf16 %v2693_v45, %v2692_v44 }
 0xb09   :  { %2728 = vmatmul.mubr.bf16.vlgmr.msra.gmra.mrb[44].mxu1 %v2694_v22 }
 0xbdc   :  { %v2729_v23 = vpop.f32.mrb[44].mxu1 }
 0xbdd   :  { %v2730_v24 = vpop.f32.mrb[45].mxu1 }
 0xbde   :  { %v2731_v25 = vpop.f32.mrb[46].mxu1 }
 0xbdf   :  { %v2733_v27 = vpop.f32.mrb[47].mxu1  ;;  %v2732_v35 = vadd.f32 %v2731_v25, %v4446_v52 }
 0xbe0   :  { %v2734_v28 = vadd.f32 %v2733_v27, %v4449_v53 }
 0xbe2   :  { %v2736_v29 = vmul.f32 0.5, %v2734_v28 }
 0xbe4   :  { %v2737_v30 = vmul.f32 1.442695, %v2736_v29 }
 0xbe6   :  { %3750 = vpow2.f32 %v2737_v30 }
 0xbf0   :  { %v3751_v34 = vpop.eup %3750 }
 0xbf1   :  { %v2739_v59 = vmul.f32 %v3751_v34, %v36_v31 }
 0xbf3   :  { %v2740_v61 = vadd.f32 %v2739_v59, %v2732_v35 }
 0xbf5   :  { %2764 = vst [vmem:[%s5161_s7 + $0x8] sm:$0xff] %v2740_v61 }

</bundles_post_ra>
